<compile_context>
chip_gen: v7x
topology: tpu7x:2x2x1
jax: 0.10.0
libtpu: 0.0.40
codegen_flags: <defaults>
</compile_context>

<pallas_src>
import jax
import jax.numpy as jnp
from jax import lax
from jax.experimental import pallas as pl
from jax.experimental.pallas import tpu as pltpu


EPS = 1e-5  # torch.nn.InstanceNorm2d default eps


def _round_up(x, m):
    return ((x + m - 1) // m) * m


def _vmem_capacity_bytes():
    try:
        return int(pltpu.get_tpu_info().vmem_capacity_bytes)
    except Exception:
        return 64 * 1024 * 1024  # conservative (v7x-sized) fallback


def _pick_batch_tile(n, in_per_b, out_per_b, vmem_cap):
    """Largest batch tile under a generation-aware VMEM budget, capped at 8.

    No forced >=2-step split: v5e/v6e are single-TensorCore, so extra grid
    steps only add per-step overhead and shrink DMA bursts.
    """
    budget = min(vmem_cap // 4, 32 * 1024 * 1024)
    per_b = 2 * (in_per_b + out_per_b)          # double-buffered input + output
    bt = int(max(1, min(n, 8, budget // max(per_b, 1))))
    while n % bt:
        bt -= 1
    return bt


def _make_convblock_kernel(*, taps, wq, wo, ho, f_len, c_out, bt,
                           single_slab, unroll):
    """taps: list of (slab_index, lane_shift) — both static Python ints."""
    inv_cnt = 1.0 / float(ho * wo)
    dense = (wq == wo)  # no garbage lanes -> no compaction needed

    def kernel(alpha_ref, mask_ref, x_ref, w_ref, o_ref):
        # alpha_ref: (1,)                f32 SMEM
        # mask_ref:  (1, f_len)          f32 VMEM (1 on valid lanes, else 0)
        # x_ref:     (Bt, T_slab, C_in, L)  bf16 VMEM
        # w_ref:     (kh*kw, C_out, C_in)   f32 VMEM
        # o_ref:     (Bt, C_out, Ho*Wo)     f32 VMEM (lane-dense stores)
        alpha = alpha_ref[0]
        mask = mask_ref[...]                                   # (1, f_len)

        @pl.loop(0, bt, unroll=unroll)
        def _per_batch(b):
            if single_slab:
                xb = x_ref[b, 0].astype(jnp.float32)           # (C_in, L)

            # ---- conv: kh*kw per-tap matmuls, f32 accumulation ----
            acc = jnp.zeros((c_out, f_len), jnp.float32)
            for t, (slab, shift) in enumerate(taps):
                if single_slab:
                    opnd = xb[:, shift:shift + f_len]          # (C_in, f_len)
                else:
                    opnd = x_ref[b, slab].astype(jnp.float32)  # (C_in, f_len)
                acc = acc + jnp.dot(w_ref[t], opnd,
                                    preferred_element_type=jnp.float32)

            # ---- InstanceNorm2d (affine=False): fused single-pass masked
            #      stats, biased variance, PyTorch defaults ----
            am = acc * mask
            s1 = jnp.sum(am, axis=-1, keepdims=True)           # (C_out, 1)
            s2 = jnp.sum(am * acc, axis=-1, keepdims=True)     # (C_out, 1)
            mean = s1 * inv_cnt
            var = jnp.maximum(s2 * inv_cnt - mean * mean, 0.0)
            y = (acc - mean) * lax.rsqrt(var + EPS)

            # ---- PReLU (single shared parameter) ----
            y = jnp.where(y > 0.0, y, alpha * y)

            # ---- drop garbage lanes and store one lane-dense row ----
            if dense:
                compact = y                                    # f_len == Ho*Wo
            else:
                compact = jnp.concatenate(
                    [y[:, h * wq:h * wq + wo] for h in range(ho)], axis=-1)
            o_ref[b] = compact.astype(o_ref.dtype)

    return kernel


def conv_block_pallas(x, weight, bias, alpha, *, stride, padding,
                      compute_dtype=jnp.bfloat16):
    """x: (N, C_in, H, W) NCHW.  Returns (N, C_out, H_out, W_out) NCHW, f32."""
    N, C_in, H, W = x.shape
    C_out, C_in_w, kh, kw = weight.shape
    assert C_in_w == C_in
    s, p = int(stride), int(padding)

    Hp, Wp = H + 2 * p, W + 2 * p
    Ho = (Hp - kh) // s + 1
    Wo = (Wp - kw) // s + 1
    P = Ho * Wo
    T = kh * kw

    xp = jnp.pad(x, ((0, 0), (0, 0), (p, p), (p, p)))

    if s == 1:
        # Single flattened padded slab; taps are realized in-kernel as
        # statically shifted lane windows (no data duplication in HBM).
        Wq = Wp                       # accumulator row pitch (padded width)
        F = Ho * Wq                   # accumulator lane length
        L = _round_up(Hp * Wp + (kw - 1), 128)
        xf = xp.reshape(N, 1, C_in, Hp * Wp)
        xf = jnp.pad(xf, ((0, 0), (0, 0), (0, 0), (0, L - Hp * Wp)))
        x_slabs = xf.astype(compute_dtype)
        taps = [(0, i * Wp + j) for i in range(kh) for j in range(kw)]
        T_slab = 1
    else:
        # stride > 1 fallback: one slab per tap (kh*kw duplication).
        Wq = Wo
        F = P
        L = P
        pieces = []
        for i in range(kh):
            for j in range(kw):
                pieces.append(
                    xp[:, :, i:i + (Ho - 1) * s + 1:s,
                             j:j + (Wo - 1) * s + 1:s].reshape(N, 1, C_in, P))
        x_slabs = jnp.concatenate(pieces, axis=1).astype(compute_dtype)
        taps = [(t, 0) for t in range(T)]
        T_slab = T

    # Weights stay f32 (tiny operand; better fidelity than bf16).
    w_taps = weight.transpose(2, 3, 0, 1).reshape(T, C_out, C_in)
    w_taps = w_taps.astype(jnp.float32)
    alpha_arr = jnp.asarray(alpha, jnp.float32).reshape(1)

    cols = jnp.arange(F, dtype=jnp.int32)
    mask = (((cols % Wq) < Wo) & (cols < Ho * Wq)).astype(jnp.float32)
    mask = mask.reshape(1, F)

    # Conv bias is exactly cancelled by the affine=False InstanceNorm that
    # follows (mean subtraction removes any per-channel constant): drop it.
    del bias

    in_item = jnp.dtype(compute_dtype).itemsize
    in_per_b = T_slab * C_in * L * in_item
    out_per_b = C_out * P * 4
    vmem_cap = _vmem_capacity_bytes()
    Bt = _pick_batch_tile(N, in_per_b, out_per_b, vmem_cap)

    kernel = _make_convblock_kernel(
        taps=taps, wq=Wq, wo=Wo, ho=Ho, f_len=F, c_out=C_out, bt=Bt,
        single_slab=(s == 1), unroll=(Bt <= 4))

    block_bytes = (2 * Bt * in_per_b + 2 * Bt * out_per_b
                   + w_taps.size * 4 + mask.size * 4)
    vmem_limit = int(min(max(block_bytes + (8 << 20), 16 << 20),
                         (vmem_cap * 3) // 4))

    cost = pl.CostEstimate(
        flops=int(2 * N * C_out * C_in * T * P),
        transcendentals=int(N * C_out),            # one rsqrt per (n, c)
        bytes_accessed=int(x_slabs.size * in_item + w_taps.size * 4
                           + mask.size * 4 + N * C_out * P * 4),
    )

    out_flat = pl.pallas_call(
        kernel,
        out_shape=jax.ShapeDtypeStruct((N, C_out, P), jnp.float32),
        grid_spec=pltpu.PrefetchScalarGridSpec(
            num_scalar_prefetch=0,
            grid=(N // Bt,),
            in_specs=[
                pl.BlockSpec(memory_space=pltpu.SMEM),                        # alpha
                pl.BlockSpec((1, F), lambda n: (0, 0)),                       # mask
                pl.BlockSpec((Bt, T_slab, C_in, L), lambda n: (n, 0, 0, 0)),  # x slabs
                pl.BlockSpec((T, C_out, C_in), lambda n: (0, 0, 0)),          # weights
            ],
            out_specs=pl.BlockSpec((Bt, C_out, P), lambda n: (n, 0, 0)),
        ),
        compiler_params=pltpu.CompilerParams(
            dimension_semantics=("parallel",),
            vmem_limit_bytes=vmem_limit,
        ),
        cost_estimate=cost,
    )(alpha_arr, mask, x_slabs, w_taps)

    # (N, C_out, Ho*Wo) is already NCHW order: free reshape, no transpose.
    return out_flat.reshape(N, C_out, Ho, Wo)


def conv_block_reference(x, weight, bias, alpha, *, stride, padding):
    """Plain-JAX f32 reference matching the PyTorch forward (with bias)."""
    conv = lax.conv_general_dilated(
        x, weight,
        window_strides=(stride, stride),
        padding=[(padding, padding), (padding, padding)],
        dimension_numbers=("NCHW", "OIHW", "NCHW"),
        precision=lax.Precision.HIGHEST,
    ) + bias.reshape(1, -1, 1, 1)
    mean = jnp.mean(conv, axis=(2, 3), keepdims=True)
    var = jnp.mean((conv - mean) ** 2, axis=(2, 3), keepdims=True)
    normed = (conv - mean) * lax.rsqrt(var + EPS)
    return jnp.where(normed > 0, normed, alpha * normed)


if __name__ == "__main__":
    # Small shapes consistent with the module.
    N, C_in, H, W = 2, 4, 16, 16
    C_out, ksize = 8, 3

    key = jax.random.PRNGKey(0)
    kx, kw_, kb = jax.random.split(key, 3)
    x = jax.random.normal(kx, (N, C_in, H, W), dtype=jnp.float32)
    weight = 0.1 * jax.random.normal(kw_, (C_out, C_in, ksize, ksize),
                                     dtype=jnp.float32)
    bias = 0.1 * jax.random.normal(kb, (C_out,), dtype=jnp.float32)
    alpha = jnp.float32(0.25)   # nn.PReLU() default: single shared param

    conv_block = jax.jit(conv_block_pallas,
                         static_argnames=("stride", "padding", "compute_dtype"))

    # --- stride=1, padding=1: optimized no-im2col path ---
    out = conv_block(x, weight, bias, alpha, stride=1, padding=1)
    out = jax.block_until_ready(out)
    assert out.shape == (N, C_out, H, W), out.shape
    ref = conv_block_reference(x, weight, bias, alpha, stride=1, padding=1)
    err = float(jnp.max(jnp.abs(out - ref)))
    assert bool(jnp.all(jnp.isfinite(out))), "non-finite output"
    assert jnp.allclose(out, ref, atol=2e-2, rtol=2e-2), err

    # --- stride=2, padding=1: per-tap-slab fallback path ---
    out2 = conv_block(x, weight, bias, alpha, stride=2, padding=1)
    out2 = jax.block_until_ready(out2)
    ref2 = conv_block_reference(x, weight, bias, alpha, stride=2, padding=1)
    assert out2.shape == ref2.shape, (out2.shape, ref2.shape)
    err2 = float(jnp.max(jnp.abs(out2 - ref2)))
    assert jnp.allclose(out2, ref2, atol=2e-2, rtol=2e-2), err2

    print("KERNEL_OK")
</pallas_src>

<mosaic_0001>
module attributes {stable_mosaic.version = 11 : i64} {
  func.func @kernel(%arg0: i32, %arg1: memref<1xf32, #tpu.memory_space<smem>>, %arg2: memref<1x288xf32, #tpu.memory_space<vmem>>, %arg3: memref<2x1x4x384xbf16, #tpu.memory_space<vmem>>, %arg4: memref<9x8x4xf32, #tpu.memory_space<vmem>>, %arg5: memref<2x8x256xf32, #tpu.memory_space<vmem>>) attributes {dimension_semantics = [#tpu.dimension_semantics<parallel>], iteration_bounds = array<i64: 1>, scalar_prefetch = 0 : i64, scratch_operands = 0 : i64, tpu.core_type = #tpu.core_type<tc>, window_params = [{transform_indices = @transform_0, window_bounds = array<i64: 1>}, {pipeline_mode = #tpu.pipeline_mode<synchronous>, transform_indices = @transform_1, window_bounds = array<i64: 1, 288>}, {transform_indices = @transform_2, window_bounds = array<i64: 2, 1, 4, 384>}, {pipeline_mode = #tpu.pipeline_mode<synchronous>, transform_indices = @transform_3, window_bounds = array<i64: 9, 8, 4>}, {transform_indices = @transform_4, window_bounds = array<i64: 2, 8, 256>}]} {
    %c0 = arith.constant 0 : index
    %0 = memref.load %arg1[%c0] : memref<1xf32, #tpu.memory_space<smem>>
    %c0_0 = arith.constant 0 : index
    %c0_1 = arith.constant 0 : index
    %1 = vector.load %arg2[%c0_0, %c0_1] : memref<1x288xf32, #tpu.memory_space<vmem>>, vector<1x288xf32>
    %c0_i32 = arith.constant 0 : i32
    %c1_i32 = arith.constant 1 : i32
    %2 = arith.muli %c0_i32, %c1_i32 : i32
    %c0_i32_2 = arith.constant 0 : i32
    %3 = arith.addi %c0_i32_2, %2 : i32
    %4 = arith.index_cast %3 : i32 to index
    %c0_3 = arith.constant 0 : index
    %c0_4 = arith.constant 0 : index
    %c0_5 = arith.constant 0 : index
    %5 = vector.load %arg3[%4, %c0_3, %c0_4, %c0_5] : memref<2x1x4x384xbf16, #tpu.memory_space<vmem>>, vector<1x1x4x384xbf16>
    %6 = vector.shape_cast %5 : vector<1x1x4x384xbf16> to vector<4x384xbf16>
    %7 = arith.extf %6 : vector<4x384xbf16> to vector<4x384xf32>
    %cst = arith.constant 0.000000e+00 : f32
    %8 = vector.broadcast %cst : f32 to vector<8x288xf32>
    %9 = vector.extract_strided_slice %7 {offsets = [0, 0], sizes = [4, 288], strides = [1, 1]} : vector<4x384xf32> to vector<4x288xf32>
    %c0_6 = arith.constant 0 : index
    %c0_7 = arith.constant 0 : index
    %c0_8 = arith.constant 0 : index
    %10 = vector.load %arg4[%c0_6, %c0_7, %c0_8] : memref<9x8x4xf32, #tpu.memory_space<vmem>>, vector<1x8x4xf32>
    %11 = vector.shape_cast %10 : vector<1x8x4xf32> to vector<8x4xf32>
    %cst_9 = arith.constant dense<0.000000e+00> : vector<8x288xf32>
    %12 = tpu.matmul %11, %9, %cst_9 {dimension_numbers = #tpu.dot_dimension_numbers<[1], [0], [0], [1], [0, 0, 1, 1], [], []>} : vector<8x4xf32>, vector<4x288xf32>, vector<8x288xf32> -> vector<8x288xf32>
    %13 = arith.addf %8, %12 : vector<8x288xf32>
    %14 = vector.extract_strided_slice %7 {offsets = [0, 1], sizes = [4, 288], strides = [1, 1]} : vector<4x384xf32> to vector<4x288xf32>
    %c1 = arith.constant 1 : index
    %c0_10 = arith.constant 0 : index
    %c0_11 = arith.constant 0 : index
    %15 = vector.load %arg4[%c1, %c0_10, %c0_11] : memref<9x8x4xf32, #tpu.memory_space<vmem>>, vector<1x8x4xf32>
    %16 = vector.shape_cast %15 : vector<1x8x4xf32> to vector<8x4xf32>
    %cst_12 = arith.constant dense<0.000000e+00> : vector<8x288xf32>
    %17 = tpu.matmul %16, %14, %cst_12 {dimension_numbers = #tpu.dot_dimension_numbers<[1], [0], [0], [1], [0, 0, 1, 1], [], []>} : vector<8x4xf32>, vector<4x288xf32>, vector<8x288xf32> -> vector<8x288xf32>
    %18 = arith.addf %13, %17 : vector<8x288xf32>
    %19 = vector.extract_strided_slice %7 {offsets = [0, 2], sizes = [4, 288], strides = [1, 1]} : vector<4x384xf32> to vector<4x288xf32>
    %c2 = arith.constant 2 : index
    %c0_13 = arith.constant 0 : index
    %c0_14 = arith.constant 0 : index
    %20 = vector.load %arg4[%c2, %c0_13, %c0_14] : memref<9x8x4xf32, #tpu.memory_space<vmem>>, vector<1x8x4xf32>
    %21 = vector.shape_cast %20 : vector<1x8x4xf32> to vector<8x4xf32>
    %cst_15 = arith.constant dense<0.000000e+00> : vector<8x288xf32>
    %22 = tpu.matmul %21, %19, %cst_15 {dimension_numbers = #tpu.dot_dimension_numbers<[1], [0], [0], [1], [0, 0, 1, 1], [], []>} : vector<8x4xf32>, vector<4x288xf32>, vector<8x288xf32> -> vector<8x288xf32>
    %23 = arith.addf %18, %22 : vector<8x288xf32>
    %24 = vector.extract_strided_slice %7 {offsets = [0, 18], sizes = [4, 288], strides = [1, 1]} : vector<4x384xf32> to vector<4x288xf32>
    %c3 = arith.constant 3 : index
    %c0_16 = arith.constant 0 : index
    %c0_17 = arith.constant 0 : index
    %25 = vector.load %arg4[%c3, %c0_16, %c0_17] : memref<9x8x4xf32, #tpu.memory_space<vmem>>, vector<1x8x4xf32>
    %26 = vector.shape_cast %25 : vector<1x8x4xf32> to vector<8x4xf32>
    %cst_18 = arith.constant dense<0.000000e+00> : vector<8x288xf32>
    %27 = tpu.matmul %26, %24, %cst_18 {dimension_numbers = #tpu.dot_dimension_numbers<[1], [0], [0], [1], [0, 0, 1, 1], [], []>} : vector<8x4xf32>, vector<4x288xf32>, vector<8x288xf32> -> vector<8x288xf32>
    %28 = arith.addf %23, %27 : vector<8x288xf32>
    %29 = vector.extract_strided_slice %7 {offsets = [0, 19], sizes = [4, 288], strides = [1, 1]} : vector<4x384xf32> to vector<4x288xf32>
    %c4 = arith.constant 4 : index
    %c0_19 = arith.constant 0 : index
    %c0_20 = arith.constant 0 : index
    %30 = vector.load %arg4[%c4, %c0_19, %c0_20] : memref<9x8x4xf32, #tpu.memory_space<vmem>>, vector<1x8x4xf32>
    %31 = vector.shape_cast %30 : vector<1x8x4xf32> to vector<8x4xf32>
    %cst_21 = arith.constant dense<0.000000e+00> : vector<8x288xf32>
    %32 = tpu.matmul %31, %29, %cst_21 {dimension_numbers = #tpu.dot_dimension_numbers<[1], [0], [0], [1], [0, 0, 1, 1], [], []>} : vector<8x4xf32>, vector<4x288xf32>, vector<8x288xf32> -> vector<8x288xf32>
    %33 = arith.addf %28, %32 : vector<8x288xf32>
    %34 = vector.extract_strided_slice %7 {offsets = [0, 20], sizes = [4, 288], strides = [1, 1]} : vector<4x384xf32> to vector<4x288xf32>
    %c5 = arith.constant 5 : index
    %c0_22 = arith.constant 0 : index
    %c0_23 = arith.constant 0 : index
    %35 = vector.load %arg4[%c5, %c0_22, %c0_23] : memref<9x8x4xf32, #tpu.memory_space<vmem>>, vector<1x8x4xf32>
    %36 = vector.shape_cast %35 : vector<1x8x4xf32> to vector<8x4xf32>
    %cst_24 = arith.constant dense<0.000000e+00> : vector<8x288xf32>
    %37 = tpu.matmul %36, %34, %cst_24 {dimension_numbers = #tpu.dot_dimension_numbers<[1], [0], [0], [1], [0, 0, 1, 1], [], []>} : vector<8x4xf32>, vector<4x288xf32>, vector<8x288xf32> -> vector<8x288xf32>
    %38 = arith.addf %33, %37 : vector<8x288xf32>
    %39 = vector.extract_strided_slice %7 {offsets = [0, 36], sizes = [4, 288], strides = [1, 1]} : vector<4x384xf32> to vector<4x288xf32>
    %c6 = arith.constant 6 : index
    %c0_25 = arith.constant 0 : index
    %c0_26 = arith.constant 0 : index
    %40 = vector.load %arg4[%c6, %c0_25, %c0_26] : memref<9x8x4xf32, #tpu.memory_space<vmem>>, vector<1x8x4xf32>
    %41 = vector.shape_cast %40 : vector<1x8x4xf32> to vector<8x4xf32>
    %cst_27 = arith.constant dense<0.000000e+00> : vector<8x288xf32>
    %42 = tpu.matmul %41, %39, %cst_27 {dimension_numbers = #tpu.dot_dimension_numbers<[1], [0], [0], [1], [0, 0, 1, 1], [], []>} : vector<8x4xf32>, vector<4x288xf32>, vector<8x288xf32> -> vector<8x288xf32>
    %43 = arith.addf %38, %42 : vector<8x288xf32>
    %44 = vector.extract_strided_slice %7 {offsets = [0, 37], sizes = [4, 288], strides = [1, 1]} : vector<4x384xf32> to vector<4x288xf32>
    %c7 = arith.constant 7 : index
    %c0_28 = arith.constant 0 : index
    %c0_29 = arith.constant 0 : index
    %45 = vector.load %arg4[%c7, %c0_28, %c0_29] : memref<9x8x4xf32, #tpu.memory_space<vmem>>, vector<1x8x4xf32>
    %46 = vector.shape_cast %45 : vector<1x8x4xf32> to vector<8x4xf32>
    %cst_30 = arith.constant dense<0.000000e+00> : vector<8x288xf32>
    %47 = tpu.matmul %46, %44, %cst_30 {dimension_numbers = #tpu.dot_dimension_numbers<[1], [0], [0], [1], [0, 0, 1, 1], [], []>} : vector<8x4xf32>, vector<4x288xf32>, vector<8x288xf32> -> vector<8x288xf32>
    %48 = arith.addf %43, %47 : vector<8x288xf32>
    %49 = vector.extract_strided_slice %7 {offsets = [0, 38], sizes = [4, 288], strides = [1, 1]} : vector<4x384xf32> to vector<4x288xf32>
    %c8 = arith.constant 8 : index
    %c0_31 = arith.constant 0 : index
    %c0_32 = arith.constant 0 : index
    %50 = vector.load %arg4[%c8, %c0_31, %c0_32] : memref<9x8x4xf32, #tpu.memory_space<vmem>>, vector<1x8x4xf32>
    %51 = vector.shape_cast %50 : vector<1x8x4xf32> to vector<8x4xf32>
    %cst_33 = arith.constant dense<0.000000e+00> : vector<8x288xf32>
    %52 = tpu.matmul %51, %49, %cst_33 {dimension_numbers = #tpu.dot_dimension_numbers<[1], [0], [0], [1], [0, 0, 1, 1], [], []>} : vector<8x4xf32>, vector<4x288xf32>, vector<8x288xf32> -> vector<8x288xf32>
    %53 = arith.addf %48, %52 : vector<8x288xf32>
    %54 = vector.broadcast %1 : vector<1x288xf32> to vector<8x288xf32>
    %55 = arith.mulf %53, %54 : vector<8x288xf32>
    %cst_34 = arith.constant dense<0.000000e+00> : vector<8xf32>
    %56 = vector.multi_reduction <add>, %55, %cst_34 [1] : vector<8x288xf32> to vector<8xf32>
    %57 = vector.shape_cast %56 : vector<8xf32> to vector<8x1xf32>
    %58 = arith.mulf %55, %53 : vector<8x288xf32>
    %cst_35 = arith.constant dense<0.000000e+00> : vector<8xf32>
    %59 = vector.multi_reduction <add>, %58, %cst_35 [1] : vector<8x288xf32> to vector<8xf32>
    %60 = vector.shape_cast %59 : vector<8xf32> to vector<8x1xf32>
    %cst_36 = arith.constant 3.906250e-03 : f32
    %61 = vector.broadcast %cst_36 : f32 to vector<8x1xf32>
    %62 = arith.mulf %57, %61 : vector<8x1xf32>
    %cst_37 = arith.constant 3.906250e-03 : f32
    %63 = vector.broadcast %cst_37 : f32 to vector<8x1xf32>
    %64 = arith.mulf %60, %63 : vector<8x1xf32>
    %65 = arith.mulf %62, %62 : vector<8x1xf32>
    %66 = arith.subf %64, %65 : vector<8x1xf32>
    %cst_38 = arith.constant 0.000000e+00 : f32
    %67 = vector.broadcast %cst_38 : f32 to vector<8x1xf32>
    %68 = arith.maximumf %66, %67 : vector<8x1xf32>
    %69 = vector.broadcast %62 : vector<8x1xf32> to vector<8x288xf32>
    %70 = arith.subf %53, %69 : vector<8x288xf32>
    %cst_39 = arith.constant 9.99999974E-6 : f32
    %71 = vector.broadcast %cst_39 : f32 to vector<8x1xf32>
    %72 = arith.addf %68, %71 : vector<8x1xf32>
    %73 = math.rsqrt %72 : vector<8x1xf32>
    %74 = vector.broadcast %73 : vector<8x1xf32> to vector<8x288xf32>
    %75 = arith.mulf %70, %74 : vector<8x288xf32>
    %cst_40 = arith.constant 0.000000e+00 : f32
    %76 = vector.broadcast %cst_40 : f32 to vector<8x288xf32>
    %77 = arith.cmpf ogt, %75, %76 : vector<8x288xf32>
    %78 = vector.broadcast %0 : f32 to vector<8x288xf32>
    %79 = arith.mulf %78, %75 : vector<8x288xf32>
    %80 = arith.select %77, %75, %79 : vector<8x288xi1>, vector<8x288xf32>
    %81 = vector.extract_strided_slice %80 {offsets = [0, 0], sizes = [8, 16], strides = [1, 1]} : vector<8x288xf32> to vector<8x16xf32>
    %82 = vector.extract_strided_slice %80 {offsets = [0, 18], sizes = [8, 16], strides = [1, 1]} : vector<8x288xf32> to vector<8x16xf32>
    %83 = vector.extract_strided_slice %80 {offsets = [0, 36], sizes = [8, 16], strides = [1, 1]} : vector<8x288xf32> to vector<8x16xf32>
    %84 = vector.extract_strided_slice %80 {offsets = [0, 54], sizes = [8, 16], strides = [1, 1]} : vector<8x288xf32> to vector<8x16xf32>
    %85 = vector.extract_strided_slice %80 {offsets = [0, 72], sizes = [8, 16], strides = [1, 1]} : vector<8x288xf32> to vector<8x16xf32>
    %86 = vector.extract_strided_slice %80 {offsets = [0, 90], sizes = [8, 16], strides = [1, 1]} : vector<8x288xf32> to vector<8x16xf32>
    %87 = vector.extract_strided_slice %80 {offsets = [0, 108], sizes = [8, 16], strides = [1, 1]} : vector<8x288xf32> to vector<8x16xf32>
    %88 = vector.extract_strided_slice %80 {offsets = [0, 126], sizes = [8, 16], strides = [1, 1]} : vector<8x288xf32> to vector<8x16xf32>
    %89 = vector.extract_strided_slice %80 {offsets = [0, 144], sizes = [8, 16], strides = [1, 1]} : vector<8x288xf32> to vector<8x16xf32>
    %90 = vector.extract_strided_slice %80 {offsets = [0, 162], sizes = [8, 16], strides = [1, 1]} : vector<8x288xf32> to vector<8x16xf32>
    %91 = vector.extract_strided_slice %80 {offsets = [0, 180], sizes = [8, 16], strides = [1, 1]} : vector<8x288xf32> to vector<8x16xf32>
    %92 = vector.extract_strided_slice %80 {offsets = [0, 198], sizes = [8, 16], strides = [1, 1]} : vector<8x288xf32> to vector<8x16xf32>
    %93 = vector.extract_strided_slice %80 {offsets = [0, 216], sizes = [8, 16], strides = [1, 1]} : vector<8x288xf32> to vector<8x16xf32>
    %94 = vector.extract_strided_slice %80 {offsets = [0, 234], sizes = [8, 16], strides = [1, 1]} : vector<8x288xf32> to vector<8x16xf32>
    %95 = vector.extract_strided_slice %80 {offsets = [0, 252], sizes = [8, 16], strides = [1, 1]} : vector<8x288xf32> to vector<8x16xf32>
    %96 = vector.extract_strided_slice %80 {offsets = [0, 270], sizes = [8, 16], strides = [1, 1]} : vector<8x288xf32> to vector<8x16xf32>
    %97 = tpu.concatenate %81, %82, %83, %84, %85, %86, %87, %88, %89, %90, %91, %92, %93, %94, %95, %96 in 1 : vector<8x16xf32>, vector<8x16xf32>, vector<8x16xf32>, vector<8x16xf32>, vector<8x16xf32>, vector<8x16xf32>, vector<8x16xf32>, vector<8x16xf32>, vector<8x16xf32>, vector<8x16xf32>, vector<8x16xf32>, vector<8x16xf32>, vector<8x16xf32>, vector<8x16xf32>, vector<8x16xf32>, vector<8x16xf32> -> vector<8x256xf32>
    %98 = arith.index_cast %3 : i32 to index
    %c0_41 = arith.constant 0 : index
    %c0_42 = arith.constant 0 : index
    %99 = vector.load %arg5[%98, %c0_41, %c0_42] : memref<2x8x256xf32, #tpu.memory_space<vmem>>, vector<1x8x256xf32>
    %100 = vector.shape_cast %99 : vector<1x8x256xf32> to vector<8x256xf32>
    %101 = vector.shape_cast %97 : vector<8x256xf32> to vector<1x8x256xf32>
    tpu.vector_store %arg5[%98, %c0_41, %c0_42], %101 {strides = array<i32>} : memref<2x8x256xf32, #tpu.memory_space<vmem>>, vector<1x8x256xf32>,
    %c1_i32_43 = arith.constant 1 : i32
    %c1_i32_44 = arith.constant 1 : i32
    %102 = arith.muli %c1_i32_43, %c1_i32_44 : i32
    %c0_i32_45 = arith.constant 0 : i32
    %103 = arith.addi %c0_i32_45, %102 : i32
    %104 = arith.index_cast %103 : i32 to index
    %c0_46 = arith.constant 0 : index
    %c0_47 = arith.constant 0 : index
    %c0_48 = arith.constant 0 : index
    %105 = vector.load %arg3[%104, %c0_46, %c0_47, %c0_48] : memref<2x1x4x384xbf16, #tpu.memory_space<vmem>>, vector<1x1x4x384xbf16>
    %106 = vector.shape_cast %105 : vector<1x1x4x384xbf16> to vector<4x384xbf16>
    %107 = arith.extf %106 : vector<4x384xbf16> to vector<4x384xf32>
    %cst_49 = arith.constant 0.000000e+00 : f32
    %108 = vector.broadcast %cst_49 : f32 to vector<8x288xf32>
    %109 = vector.extract_strided_slice %107 {offsets = [0, 0], sizes = [4, 288], strides = [1, 1]} : vector<4x384xf32> to vector<4x288xf32>
    %c0_50 = arith.constant 0 : index
    %c0_51 = arith.constant 0 : index
    %c0_52 = arith.constant 0 : index
    %110 = vector.load %arg4[%c0_50, %c0_51, %c0_52] : memref<9x8x4xf32, #tpu.memory_space<vmem>>, vector<1x8x4xf32>
    %111 = vector.shape_cast %110 : vector<1x8x4xf32> to vector<8x4xf32>
    %cst_53 = arith.constant dense<0.000000e+00> : vector<8x288xf32>
    %112 = tpu.matmul %111, %109, %cst_53 {dimension_numbers = #tpu.dot_dimension_numbers<[1], [0], [0], [1], [0, 0, 1, 1], [], []>} : vector<8x4xf32>, vector<4x288xf32>, vector<8x288xf32> -> vector<8x288xf32>
    %113 = arith.addf %108, %112 : vector<8x288xf32>
    %114 = vector.extract_strided_slice %107 {offsets = [0, 1], sizes = [4, 288], strides = [1, 1]} : vector<4x384xf32> to vector<4x288xf32>
    %c1_54 = arith.constant 1 : index
    %c0_55 = arith.constant 0 : index
    %c0_56 = arith.constant 0 : index
    %115 = vector.load %arg4[%c1_54, %c0_55, %c0_56] : memref<9x8x4xf32, #tpu.memory_space<vmem>>, vector<1x8x4xf32>
    %116 = vector.shape_cast %115 : vector<1x8x4xf32> to vector<8x4xf32>
    %cst_57 = arith.constant dense<0.000000e+00> : vector<8x288xf32>
    %117 = tpu.matmul %116, %114, %cst_57 {dimension_numbers = #tpu.dot_dimension_numbers<[1], [0], [0], [1], [0, 0, 1, 1], [], []>} : vector<8x4xf32>, vector<4x288xf32>, vector<8x288xf32> -> vector<8x288xf32>
    %118 = arith.addf %113, %117 : vector<8x288xf32>
    %119 = vector.extract_strided_slice %107 {offsets = [0, 2], sizes = [4, 288], strides = [1, 1]} : vector<4x384xf32> to vector<4x288xf32>
    %c2_58 = arith.constant 2 : index
    %c0_59 = arith.constant 0 : index
    %c0_60 = arith.constant 0 : index
    %120 = vector.load %arg4[%c2_58, %c0_59, %c0_60] : memref<9x8x4xf32, #tpu.memory_space<vmem>>, vector<1x8x4xf32>
    %121 = vector.shape_cast %120 : vector<1x8x4xf32> to vector<8x4xf32>
    %cst_61 = arith.constant dense<0.000000e+00> : vector<8x288xf32>
    %122 = tpu.matmul %121, %119, %cst_61 {dimension_numbers = #tpu.dot_dimension_numbers<[1], [0], [0], [1], [0, 0, 1, 1], [], []>} : vector<8x4xf32>, vector<4x288xf32>, vector<8x288xf32> -> vector<8x288xf32>
    %123 = arith.addf %118, %122 : vector<8x288xf32>
    %124 = vector.extract_strided_slice %107 {offsets = [0, 18], sizes = [4, 288], strides = [1, 1]} : vector<4x384xf32> to vector<4x288xf32>
    %c3_62 = arith.constant 3 : index
    %c0_63 = arith.constant 0 : index
    %c0_64 = arith.constant 0 : index
    %125 = vector.load %arg4[%c3_62, %c0_63, %c0_64] : memref<9x8x4xf32, #tpu.memory_space<vmem>>, vector<1x8x4xf32>
    %126 = vector.shape_cast %125 : vector<1x8x4xf32> to vector<8x4xf32>
    %cst_65 = arith.constant dense<0.000000e+00> : vector<8x288xf32>
    %127 = tpu.matmul %126, %124, %cst_65 {dimension_numbers = #tpu.dot_dimension_numbers<[1], [0], [0], [1], [0, 0, 1, 1], [], []>} : vector<8x4xf32>, vector<4x288xf32>, vector<8x288xf32> -> vector<8x288xf32>
    %128 = arith.addf %123, %127 : vector<8x288xf32>
    %129 = vector.extract_strided_slice %107 {offsets = [0, 19], sizes = [4, 288], strides = [1, 1]} : vector<4x384xf32> to vector<4x288xf32>
    %c4_66 = arith.constant 4 : index
    %c0_67 = arith.constant 0 : index
    %c0_68 = arith.constant 0 : index
    %130 = vector.load %arg4[%c4_66, %c0_67, %c0_68] : memref<9x8x4xf32, #tpu.memory_space<vmem>>, vector<1x8x4xf32>
    %131 = vector.shape_cast %130 : vector<1x8x4xf32> to vector<8x4xf32>
    %cst_69 = arith.constant dense<0.000000e+00> : vector<8x288xf32>
    %132 = tpu.matmul %131, %129, %cst_69 {dimension_numbers = #tpu.dot_dimension_numbers<[1], [0], [0], [1], [0, 0, 1, 1], [], []>} : vector<8x4xf32>, vector<4x288xf32>, vector<8x288xf32> -> vector<8x288xf32>
    %133 = arith.addf %128, %132 : vector<8x288xf32>
    %134 = vector.extract_strided_slice %107 {offsets = [0, 20], sizes = [4, 288], strides = [1, 1]} : vector<4x384xf32> to vector<4x288xf32>
    %c5_70 = arith.constant 5 : index
    %c0_71 = arith.constant 0 : index
    %c0_72 = arith.constant 0 : index
    %135 = vector.load %arg4[%c5_70, %c0_71, %c0_72] : memref<9x8x4xf32, #tpu.memory_space<vmem>>, vector<1x8x4xf32>
    %136 = vector.shape_cast %135 : vector<1x8x4xf32> to vector<8x4xf32>
    %cst_73 = arith.constant dense<0.000000e+00> : vector<8x288xf32>
    %137 = tpu.matmul %136, %134, %cst_73 {dimension_numbers = #tpu.dot_dimension_numbers<[1], [0], [0], [1], [0, 0, 1, 1], [], []>} : vector<8x4xf32>, vector<4x288xf32>, vector<8x288xf32> -> vector<8x288xf32>
    %138 = arith.addf %133, %137 : vector<8x288xf32>
    %139 = vector.extract_strided_slice %107 {offsets = [0, 36], sizes = [4, 288], strides = [1, 1]} : vector<4x384xf32> to vector<4x288xf32>
    %c6_74 = arith.constant 6 : index
    %c0_75 = arith.constant 0 : index
    %c0_76 = arith.constant 0 : index
    %140 = vector.load %arg4[%c6_74, %c0_75, %c0_76] : memref<9x8x4xf32, #tpu.memory_space<vmem>>, vector<1x8x4xf32>
    %141 = vector.shape_cast %140 : vector<1x8x4xf32> to vector<8x4xf32>
    %cst_77 = arith.constant dense<0.000000e+00> : vector<8x288xf32>
    %142 = tpu.matmul %141, %139, %cst_77 {dimension_numbers = #tpu.dot_dimension_numbers<[1], [0], [0], [1], [0, 0, 1, 1], [], []>} : vector<8x4xf32>, vector<4x288xf32>, vector<8x288xf32> -> vector<8x288xf32>
    %143 = arith.addf %138, %142 : vector<8x288xf32>
    %144 = vector.extract_strided_slice %107 {offsets = [0, 37], sizes = [4, 288], strides = [1, 1]} : vector<4x384xf32> to vector<4x288xf32>
    %c7_78 = arith.constant 7 : index
    %c0_79 = arith.constant 0 : index
    %c0_80 = arith.constant 0 : index
    %145 = vector.load %arg4[%c7_78, %c0_79, %c0_80] : memref<9x8x4xf32, #tpu.memory_space<vmem>>, vector<1x8x4xf32>
    %146 = vector.shape_cast %145 : vector<1x8x4xf32> to vector<8x4xf32>
    %cst_81 = arith.constant dense<0.000000e+00> : vector<8x288xf32>
    %147 = tpu.matmul %146, %144, %cst_81 {dimension_numbers = #tpu.dot_dimension_numbers<[1], [0], [0], [1], [0, 0, 1, 1], [], []>} : vector<8x4xf32>, vector<4x288xf32>, vector<8x288xf32> -> vector<8x288xf32>
    %148 = arith.addf %143, %147 : vector<8x288xf32>
    %149 = vector.extract_strided_slice %107 {offsets = [0, 38], sizes = [4, 288], strides = [1, 1]} : vector<4x384xf32> to vector<4x288xf32>
    %c8_82 = arith.constant 8 : index
    %c0_83 = arith.constant 0 : index
    %c0_84 = arith.constant 0 : index
    %150 = vector.load %arg4[%c8_82, %c0_83, %c0_84] : memref<9x8x4xf32, #tpu.memory_space<vmem>>, vector<1x8x4xf32>
    %151 = vector.shape_cast %150 : vector<1x8x4xf32> to vector<8x4xf32>
    %cst_85 = arith.constant dense<0.000000e+00> : vector<8x288xf32>
    %152 = tpu.matmul %151, %149, %cst_85 {dimension_numbers = #tpu.dot_dimension_numbers<[1], [0], [0], [1], [0, 0, 1, 1], [], []>} : vector<8x4xf32>, vector<4x288xf32>, vector<8x288xf32> -> vector<8x288xf32>
    %153 = arith.addf %148, %152 : vector<8x288xf32>
    %154 = vector.broadcast %1 : vector<1x288xf32> to vector<8x288xf32>
    %155 = arith.mulf %153, %154 : vector<8x288xf32>
    %cst_86 = arith.constant dense<0.000000e+00> : vector<8xf32>
    %156 = vector.multi_reduction <add>, %155, %cst_86 [1] : vector<8x288xf32> to vector<8xf32>
    %157 = vector.shape_cast %156 : vector<8xf32> to vector<8x1xf32>
    %158 = arith.mulf %155, %153 : vector<8x288xf32>
    %cst_87 = arith.constant dense<0.000000e+00> : vector<8xf32>
    %159 = vector.multi_reduction <add>, %158, %cst_87 [1] : vector<8x288xf32> to vector<8xf32>
    %160 = vector.shape_cast %159 : vector<8xf32> to vector<8x1xf32>
    %cst_88 = arith.constant 3.906250e-03 : f32
    %161 = vector.broadcast %cst_88 : f32 to vector<8x1xf32>
    %162 = arith.mulf %157, %161 : vector<8x1xf32>
    %cst_89 = arith.constant 3.906250e-03 : f32
    %163 = vector.broadcast %cst_89 : f32 to vector<8x1xf32>
    %164 = arith.mulf %160, %163 : vector<8x1xf32>
    %165 = arith.mulf %162, %162 : vector<8x1xf32>
    %166 = arith.subf %164, %165 : vector<8x1xf32>
    %cst_90 = arith.constant 0.000000e+00 : f32
    %167 = vector.broadcast %cst_90 : f32 to vector<8x1xf32>
    %168 = arith.maximumf %166, %167 : vector<8x1xf32>
    %169 = vector.broadcast %162 : vector<8x1xf32> to vector<8x288xf32>
    %170 = arith.subf %153, %169 : vector<8x288xf32>
    %cst_91 = arith.constant 9.99999974E-6 : f32
    %171 = vector.broadcast %cst_91 : f32 to vector<8x1xf32>
    %172 = arith.addf %168, %171 : vector<8x1xf32>
    %173 = math.rsqrt %172 : vector<8x1xf32>
    %174 = vector.broadcast %173 : vector<8x1xf32> to vector<8x288xf32>
    %175 = arith.mulf %170, %174 : vector<8x288xf32>
    %cst_92 = arith.constant 0.000000e+00 : f32
    %176 = vector.broadcast %cst_92 : f32 to vector<8x288xf32>
    %177 = arith.cmpf ogt, %175, %176 : vector<8x288xf32>
    %178 = vector.broadcast %0 : f32 to vector<8x288xf32>
    %179 = arith.mulf %178, %175 : vector<8x288xf32>
    %180 = arith.select %177, %175, %179 : vector<8x288xi1>, vector<8x288xf32>
    %181 = vector.extract_strided_slice %180 {offsets = [0, 0], sizes = [8, 16], strides = [1, 1]} : vector<8x288xf32> to vector<8x16xf32>
    %182 = vector.extract_strided_slice %180 {offsets = [0, 18], sizes = [8, 16], strides = [1, 1]} : vector<8x288xf32> to vector<8x16xf32>
    %183 = vector.extract_strided_slice %180 {offsets = [0, 36], sizes = [8, 16], strides = [1, 1]} : vector<8x288xf32> to vector<8x16xf32>
    %184 = vector.extract_strided_slice %180 {offsets = [0, 54], sizes = [8, 16], strides = [1, 1]} : vector<8x288xf32> to vector<8x16xf32>
    %185 = vector.extract_strided_slice %180 {offsets = [0, 72], sizes = [8, 16], strides = [1, 1]} : vector<8x288xf32> to vector<8x16xf32>
    %186 = vector.extract_strided_slice %180 {offsets = [0, 90], sizes = [8, 16], strides = [1, 1]} : vector<8x288xf32> to vector<8x16xf32>
    %187 = vector.extract_strided_slice %180 {offsets = [0, 108], sizes = [8, 16], strides = [1, 1]} : vector<8x288xf32> to vector<8x16xf32>
    %188 = vector.extract_strided_slice %180 {offsets = [0, 126], sizes = [8, 16], strides = [1, 1]} : vector<8x288xf32> to vector<8x16xf32>
    %189 = vector.extract_strided_slice %180 {offsets = [0, 144], sizes = [8, 16], strides = [1, 1]} : vector<8x288xf32> to vector<8x16xf32>
    %190 = vector.extract_strided_slice %180 {offsets = [0, 162], sizes = [8, 16], strides = [1, 1]} : vector<8x288xf32> to vector<8x16xf32>
    %191 = vector.extract_strided_slice %180 {offsets = [0, 180], sizes = [8, 16], strides = [1, 1]} : vector<8x288xf32> to vector<8x16xf32>
    %192 = vector.extract_strided_slice %180 {offsets = [0, 198], sizes = [8, 16], strides = [1, 1]} : vector<8x288xf32> to vector<8x16xf32>
    %193 = vector.extract_strided_slice %180 {offsets = [0, 216], sizes = [8, 16], strides = [1, 1]} : vector<8x288xf32> to vector<8x16xf32>
    %194 = vector.extract_strided_slice %180 {offsets = [0, 234], sizes = [8, 16], strides = [1, 1]} : vector<8x288xf32> to vector<8x16xf32>
    %195 = vector.extract_strided_slice %180 {offsets = [0, 252], sizes = [8, 16], strides = [1, 1]} : vector<8x288xf32> to vector<8x16xf32>
    %196 = vector.extract_strided_slice %180 {offsets = [0, 270], sizes = [8, 16], strides = [1, 1]} : vector<8x288xf32> to vector<8x16xf32>
    %197 = tpu.concatenate %181, %182, %183, %184, %185, %186, %187, %188, %189, %190, %191, %192, %193, %194, %195, %196 in 1 : vector<8x16xf32>, vector<8x16xf32>, vector<8x16xf32>, vector<8x16xf32>, vector<8x16xf32>, vector<8x16xf32>, vector<8x16xf32>, vector<8x16xf32>, vector<8x16xf32>, vector<8x16xf32>, vector<8x16xf32>, vector<8x16xf32>, vector<8x16xf32>, vector<8x16xf32>, vector<8x16xf32>, vector<8x16xf32> -> vector<8x256xf32>
    %198 = arith.index_cast %103 : i32 to index
    %c0_93 = arith.constant 0 : index
    %c0_94 = arith.constant 0 : index
    %199 = vector.load %arg5[%198, %c0_93, %c0_94] : memref<2x8x256xf32, #tpu.memory_space<vmem>>, vector<1x8x256xf32>
    %200 = vector.shape_cast %199 : vector<1x8x256xf32> to vector<8x256xf32>
    %201 = vector.shape_cast %197 : vector<8x256xf32> to vector<1x8x256xf32>
    tpu.vector_store %arg5[%198, %c0_93, %c0_94], %201 {strides = array<i32>} : memref<2x8x256xf32, #tpu.memory_space<vmem>>, vector<1x8x256xf32>,
    %c2_i32 = arith.constant 2 : i32
    return
  }
  func.func @transform_0(%arg0: i32) -> i32 {
    %c0_i32 = arith.constant 0 : i32
    %c0_i32_0 = arith.constant 0 : i32
    return %c0_i32 : i32
  }
  func.func @transform_1(%arg0: i32) -> (i32, i32) {
    %c0_i32 = arith.constant 0 : i32
    %c0_i32_0 = arith.constant 0 : i32
    %c0_i32_1 = arith.constant 0 : i32
    return %c0_i32, %c0_i32_0 : i32, i32
  }
  func.func @transform_2(%arg0: i32) -> (i32, i32, i32, i32) {
    %c0_i32 = arith.constant 0 : i32
    %c0_i32_0 = arith.constant 0 : i32
    %c0_i32_1 = arith.constant 0 : i32
    %c0_i32_2 = arith.constant 0 : i32
    return %arg0, %c0_i32, %c0_i32_0, %c0_i32_1 : i32, i32, i32, i32
  }
  func.func @transform_3(%arg0: i32) -> (i32, i32, i32) {
    %c0_i32 = arith.constant 0 : i32
    %c0_i32_0 = arith.constant 0 : i32
    %c0_i32_1 = arith.constant 0 : i32
    %c0_i32_2 = arith.constant 0 : i32
    return %c0_i32, %c0_i32_0, %c0_i32_1 : i32, i32, i32
  }
  func.func @transform_4(%arg0: i32) -> (i32, i32, i32) {
    %c0_i32 = arith.constant 0 : i32
    %c0_i32_0 = arith.constant 0 : i32
    %c0_i32_1 = arith.constant 0 : i32
    return %arg0, %c0_i32, %c0_i32_0 : i32, i32, i32
  }
}

</mosaic_0001>

<bundles_post_ra>
// kernel: conv_block_pallas.1
= control target key start
LH: loop header
LB: loop body
LE: loop exit
PB: predicated region body
PF: predicated region fallthrough
CT: control target
= control target key end

     0   :  { %v3591_v1 = vmov 0.0   ;;  %vm3592_vm0 = vmmov 0   ;;  %s3593_s17 = smov 127   ;;  %s3594_s18 = smov 126   ;;  %vm42_vm1 = vcmask 1043456   ;;  %vm35_vm2 = vcmask 1039360   ;;  %s4115_s2 = inlined_call_operand.vmem [shape: bf16[2,1,4,384], index: 2, kind: input, shape index: {}]   ;;  %s4116_s3 = inlined_call_operand.vmem [shape: f32[9,8,4], index: 3, kind: input, shape index: {}]   ;;  %s4117_s1 = inlined_call_operand.vmem [shape: f32[1,288], index: 1, kind: input, shape index: {}]   ;;  %s4118_s0 = inlined_call_operand.<no memory space> [shape: f32[1], index: 0, kind: input, shape index: {}]   ;;  %s4119_s4 = inlined_call_operand.vmem [shape: f32[2,8,256], index: 4, kind: output, shape index: {}]  }
   0x1   :  { %v3641_v0 = vld [vmem:[%s4115_s2] sm:$0x3f]  ;;  %3331 = vmatprep.subr.mxu1 %v3591_v1  ;;  %3333 = vmatprep.mubr.msk.f32.mxu1 %vm3592_vm0, %v3591_v1  ;;  %s3595_s19 = smov 110   ;;  %s3596_s20 = smov 109   ;;  %v3672_v6 = vld [vmem:[%s4115_s2 + $0x6] sm:$0x3f] }
   0x2   :  { %v3647_v2 = vunpack.c.l.bf16 %v3641_v0  ;;  %v22_v3 = vunpack.c.h.bf16 %v3641_v0  ;;  %113 = vmatprep.mubr.f32.mxu0 %v3591_v1  ;;  %s3597_s21 = smov 108   ;;  %v3675_v7 = vunpack.c.l.bf16 %v3672_v6  ;;  %s3598_s24 = smov 92   ;;  %v1625_v8 = vunpack.c.h.bf16 %v3672_v6  ;;  %v3705_v15 = vld [vmem:[%s4116_s3 + $0x8] sm:$0xff]  ;;  %v3731_v23 = vld [vmem:[%s4116_s3] sm:$0xff]  ;;  %v3750_v30 = vld [vmem:[%s4116_s3 + $0x10] sm:$0xff] }
   0x3   :  { %s3599_s25 = smov 91   ;;  %s3600_s26 = smov 90   ;;  %vm38_vm3 = vcmask 31744   ;;  %vm348_vm4 = vcmask 1031168   ;;  %vm512_vm5 = vcmask 900096   ;;  %vm676_vm6 = vcmask 891904  }
   0x4   :  { %v3653_v4 = vcombine.high %v3647_v2, %v3647_v2  ;;  %v3682_v9 = vcombine.high %v3675_v7, %v3675_v7  ;;  %v3768_v37 = vld [vmem:[%s4116_s3 + $0x18] sm:$0xff]  ;;  %vm840_vm7 = vcmask 883712   ;;  %v3786_v44 = vld [vmem:[%s4116_s3 + $0x20] sm:$0xff]  ;;  %vm1004_vm8 = vcmask 752640   ;;  %v3804_v51 = vld [vmem:[%s4116_s3 + $0x28] sm:$0xff]  ;;  %s3601_s23 = smov 124  }
   0x5   :  { %vm1168_vm9 = vcmask 744448   ;;  %v3822_v58 = vld [vmem:[%s4116_s3 + $0x30] sm:$0xff]  ;;  %vm1332_vm10 = vcmask 736256   ;;  %vm1508_vm11 = vcmask 261120   ;;  %s3606_s2 = smov 112   ;;  %s3607_s27 = smov 116  }
   0x6   :  { %v3507_v5 = vpack.i.bf16 %v22_v3, %v3653_v4  ;;  %v3547_v10 = vpack.i.bf16 %v1625_v8, %v3682_v9  ;;  %s3608_s28 = smov 104   ;;  %s3609_s29 = smov 102  }
   0x7   :  { %s3610_s30 = smov 106   ;;  %s3611_s5 = smov 100  }
   0x8   :  { %3508 = vrot.lane.b32.xlu0 %v3507_v5, %s3593_s17  ;;  %3513 = vrot.lane.b32.xlu1 %v3507_v5, %s3594_s18 }
   0xc   :  { %29 = vrot.lane.b32.xlu0 %v3647_v2, %s3593_s17  ;;  %342 = vrot.lane.b32.xlu1 %v3647_v2, %s3594_s18 }
  0x10   :  { %3518 = vrot.lane.b32.xlu0 %v3507_v5, %s3595_s19  ;;  %506 = vrot.lane.b32.xlu1 %v3647_v2, %s3595_s19 }
  0x14   :  { %3523 = vrot.lane.b32.xlu0 %v3507_v5, %s3596_s20  ;;  %670 = vrot.lane.b32.xlu1 %v3647_v2, %s3596_s20 }
  0x18   :  { %3528 = vrot.lane.b32.xlu0 %v3507_v5, %s3597_s21  ;;  %834 = vrot.lane.b32.xlu1 %v3647_v2, %s3597_s21 }
  0x1c   :  { %3533 = vrot.lane.b32.xlu0 %v3507_v5, %s3598_s24  ;;  %998 = vrot.lane.b32.xlu1 %v3647_v2, %s3598_s24 }
  0x20   :  { %3538 = vrot.lane.b32.xlu0 %v3507_v5, %s3599_s25  ;;  %1162 = vrot.lane.b32.xlu1 %v3647_v2, %s3599_s25 }
  0x24   :  { %3543 = vrot.lane.b32.xlu0 %v3507_v5, %s3600_s26  ;;  %1326 = vrot.lane.b32.xlu1 %v3647_v2, %s3600_s26 }
  0x28   :  { %3548 = vrot.lane.b32.xlu0 %v3547_v10, %s3593_s17  ;;  %1631 = vrot.lane.b32.xlu1 %v3675_v7, %s3593_s17 }
  0x2c   :  { %3553 = vrot.lane.b32.xlu0 %v3547_v10, %s3594_s18  ;;  %1940 = vrot.lane.b32.xlu1 %v3675_v7, %s3594_s18 }
  0x30   :  { %3558 = vrot.lane.b32.xlu0 %v3547_v10, %s3595_s19  ;;  %2102 = vrot.lane.b32.xlu1 %v3675_v7, %s3595_s19 }
  0x34   :  { %3563 = vrot.lane.b32.xlu0 %v3547_v10, %s3596_s20  ;;  %2264 = vrot.lane.b32.xlu1 %v3675_v7, %s3596_s20 }
  0x38   :  { %3568 = vrot.lane.b32.xlu0 %v3547_v10, %s3597_s21  ;;  %2426 = vrot.lane.b32.xlu1 %v3675_v7, %s3597_s21 }
  0x3c   :  { %3573 = vrot.lane.b32.xlu0 %v3547_v10, %s3598_s24  ;;  %2588 = vrot.lane.b32.xlu1 %v3675_v7, %s3598_s24  ;;  %s3602_s24 = smov 118  }
  0x40   :  { %3578 = vrot.lane.b32.xlu0 %v3547_v10, %s3599_s25  ;;  %2750 = vrot.lane.b32.xlu1 %v3675_v7, %s3599_s25  ;;  %s3604_s25 = smov 114  }
  0x44   :  { %3583 = vrot.lane.b32.xlu0 %v3547_v10, %s3600_s26  ;;  %2912 = vrot.lane.b32.xlu1 %v3675_v7, %s3600_s26  ;;  %s3605_s26 = smov 120  }
  0x7a   :  { %v3509_v11 = vpop.permute.xlu0 %3508  ;;  %v3514_v12 = vpop.permute.xlu1 %3513 }
  0x7b   :  { %v3511_v13 = vunpack.i.h.bf16 %v3509_v11  ;;  %v3510_v14 = vunpack.i.l.bf16 %v3509_v11  ;;  %v3516_v16 = vunpack.i.h.bf16 %v3514_v12  ;;  %v3515_v17 = vunpack.i.l.bf16 %v3514_v12  ;;  %v3858_v12 = vld [vmem:[%s4116_s3 + $0x40] sm:$0xff] }
  0x7d   :  { %3332 = vmatpush3.msk.msra.mxu1 %vm42_vm1, %v3511_v13  ;;  %v37_v18 = vsel %vm35_vm2, %v3510_v14, %v3511_v13  ;;  %v350_v21 = vsel %vm348_vm4, %v3515_v17, %v3516_v16 }
  0x7e   :  { %v30_v19 = vpop.permute.xlu0 %29  ;;  %3187 = vmatprep.subr.msk.mxu0 %vm42_vm1, %v37_v18  ;;  %3334 = vmatmul.mubr.msk.f32.vlgmr.msra.gmra.mrb[0].mxu1 %vm38_vm3, %v3705_v15  ;;  %v343_v24 = vpop.permute.xlu1 %342 }
  0x7f   :  { %v36_v20 = vsel %vm35_vm2, %v30_v19, %v3510_v14  ;;  %3336 = vmatprep.subr.mxu1 %v3591_v1  ;;  %3338 = vmatprep.mubr.msk.f32.mxu1 %vm3592_vm0, %v3591_v1  ;;  %v349_v27 = vsel %vm348_vm4, %v343_v24, %v3515_v17 }
  0x80   :  { %3188 = vmatpush1.msk.msra.mxu0 %vm42_vm1, %v36_v20  ;;  %3337 = vmatpush3.msk.msra.mxu1 %vm42_vm1, %v22_v3 }
  0x81   :  { %3189 = vmatmul.mubr.msk.f32.vlgmr.msra.gmra.mrb[0].mxu0 %vm38_vm3, %v3705_v15  ;;  %3192 = vmatprep.subr.msk.mxu0 %vm42_vm1, %v3653_v4 }
  0x82   :  { %3193 = vmatpush1.msk.msra.mxu0 %vm42_vm1, %v3647_v2  ;;  %3341 = vmatprep.subr.mxu1 %v3591_v1  ;;  %v3519_v22 = vpop.permute.xlu0 %3518  ;;  %v507_v31 = vpop.permute.xlu1 %506  ;;  %v3840_v2 = vld [vmem:[%s4116_s3 + $0x38] sm:$0xff] }
  0x83   :  { %263 = vmatprep.mubr.f32.mxu0 %v3591_v1  ;;  %3198 = vmatprep.subr.msk.mxu0 %vm42_vm1, %v350_v21  ;;  %v3521_v25 = vunpack.i.h.bf16 %v3519_v22  ;;  %v3520_v26 = vunpack.i.l.bf16 %v3519_v22 }
  0x85   :  { %v514_v28 = vsel %vm512_vm5, %v3520_v26, %v3521_v25  ;;  %v513_v34 = vsel %vm512_vm5, %v507_v31, %v3520_v26 }
  0x86   :  { %3339 = vmatmul.mubr.msk.f32.vlgmr.msra.gmra.mrb[0].mxu1 %vm38_vm3, %v3731_v23  ;;  %v3524_v29 = vpop.permute.xlu0 %3523  ;;  %v671_v38 = vpop.permute.xlu1 %670 }
  0x87   :  { %3342 = vmatpush3.msk.msra.mxu1 %vm42_vm1, %v3516_v16  ;;  %3343 = vmatprep.mubr.msk.f32.mxu1 %vm3592_vm0, %v3591_v1  ;;  %v3526_v32 = vunpack.i.h.bf16 %v3524_v29  ;;  %v3525_v33 = vunpack.i.l.bf16 %v3524_v29 }
  0x88   :  { %3346 = vmatprep.subr.mxu1 %v3591_v1 }
  0x89   :  { %3194 = vmatmul.mubr.msk.f32.vlgmr.msra.gmra.mrb[0].mxu0 %vm38_vm3, %v3731_v23  ;;  %v678_v35 = vsel %vm676_vm6, %v3525_v33, %v3526_v32  ;;  %v677_v41 = vsel %vm676_vm6, %v671_v38, %v3525_v33 }
  0x8a   :  { %3199 = vmatpush1.msk.msra.mxu0 %vm42_vm1, %v349_v27  ;;  %424 = vmatprep.mubr.f32.mxu0 %v3591_v1  ;;  %v3529_v36 = vpop.permute.xlu0 %3528  ;;  %v835_v45 = vpop.permute.xlu1 %834 }
  0x8b   :  { %3204 = vmatprep.subr.msk.mxu0 %vm42_vm1, %v514_v28  ;;  %v3531_v39 = vunpack.i.h.bf16 %v3529_v36  ;;  %v3530_v40 = vunpack.i.l.bf16 %v3529_v36 }
  0x8d   :  { %v842_v42 = vsel %vm840_vm7, %v3530_v40, %v3531_v39  ;;  %v841_v48 = vsel %vm840_vm7, %v835_v45, %v3530_v40 }
  0x8e   :  { %3344 = vmatmul.mubr.msk.f32.vlgmr.msra.gmra.mrb[0].mxu1 %vm38_vm3, %v3750_v30  ;;  %v3534_v43 = vpop.permute.xlu0 %3533  ;;  %v999_v52 = vpop.permute.xlu1 %998 }
  0x8f   :  { %3347 = vmatpush3.msk.msra.mxu1 %vm42_vm1, %v3521_v25  ;;  %3348 = vmatprep.mubr.msk.f32.mxu1 %vm3592_vm0, %v3591_v1  ;;  %v3536_v46 = vunpack.i.h.bf16 %v3534_v43  ;;  %v3535_v47 = vunpack.i.l.bf16 %v3534_v43 }
  0x90   :  { %3351 = vmatprep.subr.mxu1 %v3591_v1 }
  0x91   :  { %3200 = vmatmul.mubr.msk.f32.vlgmr.msra.gmra.mrb[0].mxu0 %vm38_vm3, %v3750_v30  ;;  %v1006_v49 = vsel %vm1004_vm8, %v3535_v47, %v3536_v46  ;;  %v1005_v55 = vsel %vm1004_vm8, %v999_v52, %v3535_v47 }
  0x92   :  { %3205 = vmatpush1.msk.msra.mxu0 %vm42_vm1, %v513_v34  ;;  %588 = vmatprep.mubr.f32.mxu0 %v3591_v1  ;;  %v3539_v50 = vpop.permute.xlu0 %3538  ;;  %v1163_v59 = vpop.permute.xlu1 %1162 }
  0x93   :  { %3210 = vmatprep.subr.msk.mxu0 %vm42_vm1, %v678_v35  ;;  %v3541_v53 = vunpack.i.h.bf16 %v3539_v50  ;;  %v3540_v54 = vunpack.i.l.bf16 %v3539_v50 }
  0x95   :  { %v1170_v56 = vsel %vm1168_vm9, %v3540_v54, %v3541_v53  ;;  %v1169_v62 = vsel %vm1168_vm9, %v1163_v59, %v3540_v54 }
  0x96   :  { %3349 = vmatmul.mubr.msk.f32.vlgmr.msra.gmra.mrb[0].mxu1 %vm38_vm3, %v3768_v37  ;;  %v3544_v57 = vpop.permute.xlu0 %3543  ;;  %v1327_v3 = vpop.permute.xlu1 %1326 }
  0x97   :  { %3352 = vmatpush3.msk.msra.mxu1 %vm42_vm1, %v3526_v32  ;;  %3353 = vmatprep.mubr.msk.f32.mxu1 %vm3592_vm0, %v3591_v1  ;;  %v3546_v60 = vunpack.i.h.bf16 %v3544_v57  ;;  %v3545_v61 = vunpack.i.l.bf16 %v3544_v57 }
  0x98   :  { %3356 = vmatprep.subr.mxu1 %v3591_v1 }
  0x99   :  { %3206 = vmatmul.mubr.msk.f32.vlgmr.msra.gmra.mrb[0].mxu0 %vm38_vm3, %v3768_v37  ;;  %v1334_v63 = vsel %vm1332_vm10, %v3545_v61, %v3546_v60  ;;  %v1333_v10 = vsel %vm1332_vm10, %v1327_v3, %v3545_v61 }
  0x9a   :  { %3211 = vmatpush1.msk.msra.mxu0 %vm42_vm1, %v677_v41  ;;  %752 = vmatprep.mubr.f32.mxu0 %v3591_v1  ;;  %v3549_v0 = vpop.permute.xlu0 %3548  ;;  %v1632_v13 = vpop.permute.xlu1 %1631 }
  0x9b   :  { %3216 = vmatprep.subr.msk.mxu0 %vm42_vm1, %v842_v42  ;;  %v3551_v4 = vunpack.i.h.bf16 %v3549_v0  ;;  %v3550_v5 = vunpack.i.l.bf16 %v3549_v0 }
  0x9d   :  { %v1638_v11 = vsel %vm35_vm2, %v3550_v5, %v3551_v4  ;;  %v1637_v16 = vsel %vm35_vm2, %v1632_v13, %v3550_v5  ;;  %vm1600_vm2 = vcmask 130048  }
  0x9e   :  { %3354 = vmatmul.mubr.msk.f32.vlgmr.msra.gmra.mrb[0].mxu1 %vm38_vm3, %v3786_v44  ;;  %v3554_v14 = vpop.permute.xlu0 %3553  ;;  %v1941_v6 = vpop.permute.xlu1 %1940 }
  0x9f   :  { %3357 = vmatpush3.msk.msra.mxu1 %vm42_vm1, %v3531_v39  ;;  %3358 = vmatprep.mubr.msk.f32.mxu1 %vm3592_vm0, %v3591_v1  ;;  %v3556_v17 = vunpack.i.h.bf16 %v3554_v14  ;;  %v3555_v18 = vunpack.i.l.bf16 %v3554_v14 }
  0xa0   :  { %3361 = vmatprep.subr.mxu1 %v3591_v1 }
  0xa1   :  { %3212 = vmatmul.mubr.msk.f32.vlgmr.msra.gmra.mrb[0].mxu0 %vm38_vm3, %v3786_v44  ;;  %v1947_v19 = vsel %vm348_vm4, %v3555_v18, %v3556_v17  ;;  %v1946_v21 = vsel %vm348_vm4, %v1941_v6, %v3555_v18  ;;  %vm1605_vm4 = vcmask 523264  }
  0xa2   :  { %3217 = vmatpush1.msk.msra.mxu0 %vm42_vm1, %v841_v48  ;;  %916 = vmatprep.mubr.f32.mxu0 %v3591_v1  ;;  %v3559_v20 = vpop.permute.xlu0 %3558  ;;  %v2103_v22 = vpop.permute.xlu1 %2102 }
  0xa3   :  { %3222 = vmatprep.subr.msk.mxu0 %vm42_vm1, %v1006_v49 }
  0xa6   :  { %3359 = vmatmul.mubr.msk.f32.vlgmr.msra.gmra.mrb[0].mxu1 %vm38_vm3, %v3804_v51  ;;  %v2265_v28 = vpop.permute.xlu1 %2264 }
  0xa7   :  { %3362 = vmatpush3.msk.msra.mxu1 %vm42_vm1, %v3536_v46  ;;  %3363 = vmatprep.mubr.msk.f32.mxu1 %vm3592_vm0, %v3591_v1 }
  0xa8   :  { %3366 = vmatprep.subr.mxu1 %v3591_v1 }
  0xa9   :  { %3218 = vmatmul.mubr.msk.f32.vlgmr.msra.gmra.mrb[0].mxu0 %vm38_vm3, %v3804_v51 }
  0xaa   :  { %3223 = vmatpush1.msk.msra.mxu0 %vm42_vm1, %v1005_v55  ;;  %1080 = vmatprep.mubr.f32.mxu0 %v3591_v1  ;;  %v2427_v34 = vpop.permute.xlu1 %2426 }
  0xab   :  { %3228 = vmatprep.subr.msk.mxu0 %vm42_vm1, %v1170_v56  ;;  %v19_v56 = vld [vmem:[%s4117_s1] sm:$0x7] }
  0xae   :  { %3364 = vmatmul.mubr.msk.f32.vlgmr.msra.gmra.mrb[0].mxu1 %vm38_vm3, %v3822_v58  ;;  %v2589_v40 = vpop.permute.xlu1 %2588 }
  0xaf   :  { %3367 = vmatpush3.msk.msra.mxu1 %vm42_vm1, %v3541_v53  ;;  %3368 = vmatprep.mubr.msk.f32.mxu1 %vm3592_vm0, %v3591_v1  ;;  %v1489_v53 = vlaneseq }
  0xb0   :  { %3371 = vmatprep.subr.mxu1 %v3591_v1 }
  0xb1   :  { %3224 = vmatmul.mubr.msk.f32.vlgmr.msra.gmra.mrb[0].mxu0 %vm38_vm3, %v3822_v58  ;;  %v1490_v54 = vshrl.u32 %v1489_v53, 7 }
  0xb2   :  { %3229 = vmatpush1.msk.msra.mxu0 %vm42_vm1, %v1169_v62  ;;  %1244 = vmatprep.mubr.f32.mxu0 %v3591_v1  ;;  %v2751_v46 = vpop.permute.xlu1 %2750 }
  0xb3   :  { %3234 = vmatprep.subr.msk.mxu0 %vm42_vm1, %v1334_v63  ;;  %v1499_v55 = vsub.s32 2, %v1490_v54  ;;  %v1491_v57 = vsub.s32 0, %v1490_v54 }
  0xb5   :  { %v1500_v59 = vrot.slane %v19_v56, %v1499_v55  ;;  %v1492_v61 = vrot.slane %v19_v56, %v1491_v57 }
  0xb6   :  { %3369 = vmatmul.mubr.msk.f32.vlgmr.msra.gmra.mrb[0].mxu1 %vm38_vm3, %v3840_v2 }
  0xb7   :  { %3372 = vmatpush3.msk.msra.mxu1 %vm42_vm1, %v3546_v60  ;;  %3373 = vmatprep.mubr.msk.f32.mxu1 %vm3592_vm0, %v3591_v1 }
  0xb8   :  { %3376 = vmatprep.subr.mxu1 %v3591_v1 }
  0xb9   :  { %3230 = vmatmul.mubr.msk.f32.vlgmr.msra.gmra.mrb[0].mxu0 %vm38_vm3, %v3840_v2 }
  0xba   :  { %3235 = vmatpush1.msk.msra.mxu0 %vm42_vm1, %v1333_v10  ;;  %1408 = vmatprep.mubr.f32.mxu0 %v3591_v1 }
  0xbb   :  { %3241 = vmatprep.subr.msk.mxu0 %vm42_vm1, %v1638_v11 }
  0xbe   :  { %3374 = vmatmul.mubr.msk.f32.vlgmr.msra.gmra.mrb[0].mxu1 %vm38_vm3, %v3858_v12 }
  0xbf   :  { %3377 = vmatpush3.msk.msra.mxu1 %vm42_vm1, %v3551_v4  ;;  %3378 = vmatprep.mubr.msk.f32.mxu1 %vm3592_vm0, %v3591_v1 }
  0xc0   :  { %3381 = vmatprep.subr.mxu1 %v3591_v1 }
  0xc1   :  { %3236 = vmatmul.mubr.msk.f32.vlgmr.msra.gmra.mrb[0].mxu0 %vm38_vm3, %v3858_v12 }
  0xc2   :  { %3242 = vmatpush1.msk.msra.mxu0 %vm42_vm1, %v1637_v16  ;;  %3379 = vmatmul.mubr.msk.f32.vlgmr.msra.gmra.mrb[2].mxu1 %vm38_vm3, %v3705_v15 }
  0xc3   :  { %1712 = vmatprep.mubr.f32.mxu0 %v3591_v1  ;;  %3246 = vmatprep.subr.msk.mxu0 %vm42_vm1, %v3682_v9  ;;  %v3560_v9 = vunpack.i.l.bf16 %v3559_v20 }
  0xc4   :  { %3382 = vmatpush3.msk.msra.mxu1 %vm42_vm1, %v1625_v8  ;;  %3383 = vmatprep.mubr.msk.f32.mxu1 %vm3592_vm0, %v3591_v1  ;;  %v3561_v8 = vunpack.i.h.bf16 %v3559_v20 }
  0xc5   :  { %3243 = vmatmul.mubr.msk.f32.vlgmr.msra.gmra.mrb[2].mxu0 %vm38_vm3, %v3705_v15  ;;  %3386 = vmatprep.subr.mxu1 %v3591_v1  ;;  %v3564_v15 = vpop.permute.xlu0 %3563  ;;  %v2108_v26 = vsel %vm512_vm5, %v2103_v22, %v3560_v9 }
  0xc6   :  { %3247 = vmatpush1.msk.msra.mxu0 %vm42_vm1, %v3675_v7  ;;  %1862 = vmatprep.mubr.f32.mxu0 %v3591_v1  ;;  %v2109_v7 = vsel %vm512_vm5, %v3560_v9, %v3561_v8  ;;  %v3566_v24 = vunpack.i.h.bf16 %v3564_v15  ;;  %v3565_v25 = vunpack.i.l.bf16 %v3564_v15  ;;  %vm1607_vm5 = vcmask 654336  }
  0xc7   :  { %3252 = vmatprep.subr.msk.mxu0 %vm42_vm1, %v1947_v19 }
  0xc8   :  { %v2270_v32 = vsel %vm676_vm6, %v2265_v28, %v3565_v25 }
  0xc9   :  { %v3569_v27 = vpop.permute.xlu0 %3568 }
  0xca   :  { %3384 = vmatmul.mubr.msk.f32.vlgmr.msra.gmra.mrb[2].mxu1 %vm38_vm3, %v3731_v23  ;;  %v3571_v29 = vunpack.i.h.bf16 %v3569_v27  ;;  %v3570_v31 = vunpack.i.l.bf16 %v3569_v27 }
  0xcb   :  { %3387 = vmatpush3.msk.msra.mxu1 %vm42_vm1, %v3556_v17  ;;  %3388 = vmatprep.mubr.msk.f32.mxu1 %vm3592_vm0, %v3591_v1 }
  0xcc   :  { %3391 = vmatprep.subr.mxu1 %v3591_v1  ;;  %v2432_v38 = vsel %vm840_vm7, %v2427_v34, %v3570_v31 }
  0xcd   :  { %3248 = vmatmul.mubr.msk.f32.vlgmr.msra.gmra.mrb[2].mxu0 %vm38_vm3, %v3731_v23  ;;  %v2271_v23 = vsel %vm676_vm6, %v3565_v25, %v3566_v24  ;;  %v3574_v33 = vpop.permute.xlu0 %3573  ;;  %vm1609_vm6 = vcmask 785408  }
  0xce   :  { %3253 = vmatpush1.msk.msra.mxu0 %vm42_vm1, %v1946_v21  ;;  %2021 = vmatprep.mubr.f32.mxu0 %v3591_v1  ;;  %v3576_v35 = vunpack.i.h.bf16 %v3574_v33  ;;  %v3575_v36 = vunpack.i.l.bf16 %v3574_v33 }
  0xcf   :  { %3258 = vmatprep.subr.msk.mxu0 %vm42_vm1, %v2109_v7 }
  0xd0   :  { %v2594_v43 = vsel %vm1004_vm8, %v2589_v40, %v3575_v36  ;;  %v4007_v40 = vstv %s4118_s0  ;;  %s3603_s0 = smov 122  }
  0xd1   :  { %v3579_v39 = vpop.permute.xlu0 %3578 }
  0xd2   :  { %3389 = vmatmul.mubr.msk.f32.vlgmr.msra.gmra.mrb[2].mxu1 %vm38_vm3, %v3750_v30  ;;  %v3581_v41 = vunpack.i.h.bf16 %v3579_v39  ;;  %v3580_v42 = vunpack.i.l.bf16 %v3579_v39 }
  0xd3   :  { %3392 = vmatpush3.msk.msra.mxu1 %vm42_vm1, %v3561_v8  ;;  %3393 = vmatprep.mubr.msk.f32.mxu1 %vm3592_vm0, %v3591_v1 }
  0xd4   :  { %3396 = vmatprep.subr.mxu1 %v3591_v1  ;;  %v2756_v49 = vsel %vm1168_vm9, %v2751_v46, %v3580_v42 }
  0xd5   :  { %3254 = vmatmul.mubr.msk.f32.vlgmr.msra.gmra.mrb[2].mxu0 %vm38_vm3, %v3750_v30  ;;  %v2433_v30 = vsel %vm840_vm7, %v3570_v31, %v3571_v29  ;;  %v3584_v45 = vpop.permute.xlu0 %3583  ;;  %vm1568_vm7 = vcmask 932864  }
  0xd6   :  { %3259 = vmatpush1.msk.msra.mxu0 %vm42_vm1, %v2108_v26  ;;  %2183 = vmatprep.mubr.f32.mxu0 %v3591_v1  ;;  %v3586_v47 = vunpack.i.h.bf16 %v3584_v45  ;;  %v3585_v48 = vunpack.i.l.bf16 %v3584_v45 }
  0xd7   :  { %3264 = vmatprep.subr.msk.mxu0 %vm42_vm1, %v2271_v23 }
  0xd8   :  { %v2919_v50 = vsel %vm1332_vm10, %v3585_v48, %v3586_v47 }
  0xda   :  { %3394 = vmatmul.mubr.msk.f32.vlgmr.msra.gmra.mrb[2].mxu1 %vm38_vm3, %v3768_v37 }
  0xdb   :  { %3397 = vmatpush3.msk.msra.mxu1 %vm42_vm1, %v3566_v24  ;;  %3398 = vmatprep.mubr.msk.f32.mxu1 %vm3592_vm0, %v3591_v1 }
  0xdc   :  { %3401 = vmatprep.subr.mxu1 %v3591_v1 }
  0xdd   :  { %3260 = vmatmul.mubr.msk.f32.vlgmr.msra.gmra.mrb[2].mxu0 %vm38_vm3, %v3768_v37  ;;  %v2595_v37 = vsel %vm1004_vm8, %v3575_v36, %v3576_v35  ;;  %vm1611_vm8 = vcmask 916480  }
  0xde   :  { %3265 = vmatpush1.msk.msra.mxu0 %vm42_vm1, %v2270_v32  ;;  %2345 = vmatprep.mubr.f32.mxu0 %v3591_v1 }
  0xdf   :  { %3270 = vmatprep.subr.msk.mxu0 %vm42_vm1, %v2433_v30 }
  0xe2   :  { %3399 = vmatmul.mubr.msk.f32.vlgmr.msra.gmra.mrb[2].mxu1 %vm38_vm3, %v3786_v44 }
  0xe3   :  { %3402 = vmatpush3.msk.msra.mxu1 %vm42_vm1, %v3571_v29  ;;  %3403 = vmatprep.mubr.msk.f32.mxu1 %vm3592_vm0, %v3591_v1 }
  0xe4   :  { %3406 = vmatprep.subr.mxu1 %v3591_v1 }
  0xe5   :  { %3266 = vmatmul.mubr.msk.f32.vlgmr.msra.gmra.mrb[2].mxu0 %vm38_vm3, %v3786_v44  ;;  %v2757_v44 = vsel %vm1168_vm9, %v3580_v42, %v3581_v41  ;;  %vm1594_vm9 = vcmask 818176  }
  0xe6   :  { %3271 = vmatpush1.msk.msra.mxu0 %vm42_vm1, %v2432_v38  ;;  %2507 = vmatprep.mubr.f32.mxu0 %v3591_v1 }
  0xe7   :  { %3276 = vmatprep.subr.msk.mxu0 %vm42_vm1, %v2595_v37 }
  0xea   :  { %3404 = vmatmul.mubr.msk.f32.vlgmr.msra.gmra.mrb[2].mxu1 %vm38_vm3, %v3804_v51 }
  0xeb   :  { %3407 = vmatpush3.msk.msra.mxu1 %vm42_vm1, %v3576_v35  ;;  %3408 = vmatprep.mubr.msk.f32.mxu1 %vm3592_vm0, %v3591_v1 }
  0xec   :  { %3411 = vmatprep.subr.mxu1 %v3591_v1 }
  0xed   :  { %3272 = vmatmul.mubr.msk.f32.vlgmr.msra.gmra.mrb[2].mxu0 %vm38_vm3, %v3804_v51  ;;  %v2913_v51 = vpop.permute.xlu1 %2912 }
  0xee   :  { %3277 = vmatpush1.msk.msra.mxu0 %vm42_vm1, %v2594_v43  ;;  %2669 = vmatprep.mubr.f32.mxu0 %v3591_v1  ;;  %v2918_v52 = vsel %vm1332_vm10, %v2913_v51, %v3585_v48 }
  0xef   :  { %3282 = vmatprep.subr.msk.mxu0 %vm42_vm1, %v2757_v44 }
  0xf2   :  { %3409 = vmatmul.mubr.msk.f32.vlgmr.msra.gmra.mrb[2].mxu1 %vm38_vm3, %v3822_v58 }
  0xf3   :  { %3412 = vmatpush3.msk.msra.mxu1 %vm42_vm1, %v3581_v41  ;;  %3413 = vmatprep.mubr.msk.f32.mxu1 %vm3592_vm0, %v3591_v1 }
  0xf4   :  { %3416 = vmatprep.subr.mxu1 %v3591_v1 }
  0xf5   :  { %3278 = vmatmul.mubr.msk.f32.vlgmr.msra.gmra.mrb[2].mxu0 %vm38_vm3, %v3822_v58  ;;  %v1495_v58 = vsub.s32 1, %v1490_v54 }
  0xf6   :  { %3283 = vmatpush1.msk.msra.mxu0 %vm42_vm1, %v2756_v49  ;;  %2831 = vmatprep.mubr.f32.mxu0 %v3591_v1 }
  0xf7   :  { %3288 = vmatprep.subr.msk.mxu0 %vm42_vm1, %v2919_v50  ;;  %v1496_v62 = vrot.slane %v19_v56, %v1495_v58 }
  0xfa   :  { %3414 = vmatmul.mubr.msk.f32.vlgmr.msra.gmra.mrb[2].mxu1 %vm38_vm3, %v3840_v2 }
  0xfb   :  { %3417 = vmatpush3.msk.msra.mxu1 %vm42_vm1, %v3586_v47  ;;  %3418 = vmatprep.mubr.msk.f32.mxu1 %vm3592_vm0, %v3591_v1 }
  0xfd   :  { %3284 = vmatmul.mubr.msk.f32.vlgmr.msra.gmra.mrb[2].mxu0 %vm38_vm3, %v3840_v2 }
  0xfe   :  { %3289 = vmatpush1.msk.msra.mxu0 %vm42_vm1, %v2918_v52  ;;  %2993 = vmatprep.mubr.f32.mxu0 %v3591_v1 }
 0x102   :  { %3419 = vmatmul.mubr.msk.f32.vlgmr.msra.gmra.mrb[2].mxu1 %vm38_vm3, %v3858_v12 }
 0x105   :  { %3290 = vmatmul.mubr.msk.f32.vlgmr.msra.gmra.mrb[2].mxu0 %vm38_vm3, %v3858_v12  ;;  %vm1603_vm3 = vcmask 392192  }
 0x191   :  { %v3984_v60 = vpop.f32.mrb[0].mxu1 }
 0x192   :  { %v3375_v1 = vpop.f32.mrb[1].mxu1  ;;  %v1506_v63 = vmul.f32 %v1500_v59, %v3984_v60 }
 0x194   :  { %v1410_v0 = vpop.f32.mrb[0].mxu0  ;;  %v1515_v5 = vmul.f32 %v1506_v63, %v3984_v60  ;;  %v1509_v13 = vsel %vm1508_vm11, %v1506_v63, 0.0 }
 0x195   :  { %v1504_v2 = vmul.f32 %v1492_v61, %v1410_v0  ;;  %v1412_v3 = vpop.f32.mrb[1].mxu0 }
 0x196   :  { %v1505_v4 = vmul.f32 %v1496_v62, %v1412_v3  ;;  %v1517_v17 = vsel %vm1508_vm11, %v1515_v5, 0.0 }
 0x197   :  { %v1513_v10 = vmul.f32 %v1504_v2, %v1410_v0 }
 0x198   :  { %v1514_v11 = vmul.f32 %v1505_v4, %v1412_v3  ;;  %v1507_v12 = vadd.f32 %v1505_v4, %v1504_v2 }
 0x19a   :  { %v1510_v14 = vadd.f32 %v1509_v13, %v1507_v12  ;;  %v1516_v16 = vadd.f32 %v1514_v11, %v1513_v10 }
 0x19c   :  { %1511 = vadd.xlane.f32.xlu0 %v1510_v14  ;;  %v1518_v18 = vadd.f32 %v1517_v17, %v1516_v16 }
 0x1a0   :  { %1519 = vadd.xlane.f32.xlu0 %v1518_v18 }
 0x1d5   :  { %v3990_v19 = vpop.f32.mrb[2].mxu1 }
 0x1d6   :  { %v3420_v20 = vpop.f32.mrb[3].mxu1  ;;  %v3075_v6 = vmul.f32 %v3990_v19, %v1500_v59 }
 0x1d8   :  { %v3993_v8 = vpop.f32.mrb[2].mxu0  ;;  %v3083_v15 = vmul.f32 %v3075_v6, %v3990_v19  ;;  %v3077_v26 = vsel %vm1508_vm11, %v3075_v6, 0.0 }
 0x1d9   :  { %v3073_v9 = vmul.f32 %v3993_v8, %v1492_v61  ;;  %v3996_v21 = vpop.f32.mrb[3].mxu0 }
 0x1da   :  { %v3074_v7 = vmul.f32 %v3996_v21, %v1496_v62  ;;  %v3085_v28 = vsel %vm1508_vm11, %v3083_v15, 0.0 }
 0x1db   :  { %v3081_v22 = vmul.f32 %v3073_v9, %v3993_v8 }
 0x1dc   :  { %v3082_v24 = vmul.f32 %v3074_v7, %v3996_v21  ;;  %v3076_v25 = vadd.f32 %v3074_v7, %v3073_v9 }
 0x1de   :  { %v3078_v23 = vadd.f32 %v3077_v26, %v3076_v25  ;;  %v3084_v27 = vadd.f32 %v3082_v24, %v3081_v22 }
 0x1e0   :  { %3079 = vadd.xlane.f32.xlu1 %v3078_v23  ;;  %v3086_v29 = vadd.f32 %v3085_v28, %v3084_v27 }
 0x1e2   :  { %3087 = vadd.xlane.f32.xlu0 %v3086_v29 }
 0x229   :  { %v1512_v31 = vpop.xlane.xlu0 %1511 }
 0x22a   :  { %v1521_v32 = vmul.f32 0.00390625, %v1512_v31 }
 0x22c   :  { %v1523_v33 = vmul.f32 %v1521_v32, %v1521_v32  ;;  %v1526_v37 = vsub.f32 %v1410_v0, %v1521_v32  ;;  %v1527_v44 = vsub.f32 %v1412_v3, %v1521_v32  ;;  %v1528_v48 = vsub.f32 %v3984_v60, %v1521_v32 }
 0x22d   :  { %v1520_v30 = vpop.xlane.xlu0 %1519 }
 0x22e   :  { %v1522_v34 = vmul.f32 0.00390625, %v1520_v30 }
 0x230   :  { %v1524_v35 = vsub.f32 %v1522_v34, %v1523_v33 }
 0x232   :  { %v1525_v36 = vmax.f32 %v1524_v35, 0.0 }
 0x234   :  { %v1529_v38 = vadd.f32 1e-05, %v1525_v36 }
 0x236   :  { %3587 = vrsqrt.f32 %v1529_v38 }
 0x240   :  { %v3588_v39 = vpop.eup %3587 }
 0x241   :  { %v1531_v41 = vmul.f32 %v3588_v39, %v1526_v37  ;;  %v1532_v45 = vmul.f32 %v3588_v39, %v1527_v44  ;;  %v1533_v49 = vmul.f32 %v3588_v39, %v1528_v48 }
 0x243   :  { %vm1534_vm12 = vcmp.gt.f32.partialorder %v1531_v41, 0.0  ;;  %v1538_v42 = vmul.f32 %v4007_v40, %v1531_v41  ;;  %v1539_v46 = vmul.f32 %v4007_v40, %v1532_v45  ;;  %vm1535_vm13 = vcmp.gt.f32.partialorder %v1532_v45, 0.0 }
 0x244   :  { %v1540_v50 = vmul.f32 %v4007_v40, %v1533_v49  ;;  %vm1536_vm14 = vcmp.gt.f32.partialorder %v1533_v49, 0.0 }
 0x245   :  { %v4010_v43 = vsel %vm1534_vm12, %v1531_v41, %v1538_v42  ;;  %v1542_v47 = vsel %vm1535_vm13, %v1532_v45, %v1539_v46 }
 0x246   :  { %1548 = vrot.lane.b32.xlu0 %v4010_v43, %s3601_s23  ;;  %1545 = vrot.lane.b32.xlu1 %v4010_v43, %s3594_s18  ;;  %v1543_v51 = vsel %vm1536_vm14, %v1533_v49, %v1540_v50 }
 0x24a   :  { %1557 = vrot.lane.b32.xlu0 %v4010_v43, %s3602_s24  ;;  %1551 = vrot.lane.b32.xlu1 %v4010_v43, %s3603_s0 }
 0x24e   :  { %1564 = vrot.lane.b32.xlu0 %v4010_v43, %s3604_s25  ;;  %1554 = vrot.lane.b32.xlu1 %v4010_v43, %s3605_s26 }
 0x252   :  { %1571 = vrot.lane.b32.xlu0 %v1542_v47, %s3606_s2  ;;  %1560 = vrot.lane.b32.xlu1 %v4010_v43, %s3607_s27 }
 0x256   :  { %1577 = vrot.lane.b32.xlu0 %v1542_v47, %s3597_s21  ;;  %1566 = vrot.lane.b32.xlu1 %v1542_v47, %s3604_s25 }
 0x25a   :  { %1583 = vrot.lane.b32.xlu0 %v1542_v47, %s3608_s28  ;;  %1574 = vrot.lane.b32.xlu1 %v1542_v47, %s3595_s19 }
 0x25e   :  { %1586 = vrot.lane.b32.xlu0 %v1542_v47, %s3609_s29  ;;  %1580 = vrot.lane.b32.xlu1 %v1542_v47, %s3610_s30 }
 0x262   :  { %1592 = vrot.lane.b32.xlu0 %v1543_v51, %s3611_s5  ;;  %1590 = vrot.lane.b32.xlu1 %v1542_v47, %s3611_s5 }
 0x26d   :  { %v3080_v52 = vpop.xlane.xlu1 %3079 }
 0x26e   :  { %v3089_v53 = vmul.f32 0.00390625, %v3080_v52 }
 0x26f   :  { %v3088_v54 = vpop.xlane.xlu0 %3087 }
 0x270   :  { %v3091_v55 = vmul.f32 %v3089_v53, %v3089_v53  ;;  %v3090_v56 = vmul.f32 0.00390625, %v3088_v54  ;;  %v3094_v60 = vsub.f32 %v3993_v8, %v3089_v53  ;;  %v3095_v61 = vsub.f32 %v3996_v21, %v3089_v53 }
 0x271   :  { %v3096_v5 = vsub.f32 %v3990_v19, %v3089_v53 }
 0x272   :  { %v3092_v57 = vsub.f32 %v3090_v56, %v3091_v55 }
 0x274   :  { %v3093_v58 = vmax.f32 %v3092_v57, 0.0 }
 0x276   :  { %v3097_v59 = vadd.f32 1e-05, %v3093_v58 }
 0x278   :  { %3589 = vrsqrt.f32 %v3097_v59 }
 0x282   :  { %v3590_v1 = vpop.eup %3589 }
 0x283   :  { %v3100_v62 = vmul.f32 %v3590_v1, %v3095_v61  ;;  %v3099_v63 = vmul.f32 %v3590_v1, %v3094_v60  ;;  %v3101_v10 = vmul.f32 %v3590_v1, %v3096_v5 }
 0x285   :  { %vm3103_vm15 = vcmp.gt.f32.partialorder %v3100_v62, 0.0  ;;  %v3106_v0 = vmul.f32 %v3100_v62, %v4007_v40  ;;  %vm3102_vm0 = vcmp.gt.f32.partialorder %v3099_v63, 0.0  ;;  %v3105_v2 = vmul.f32 %v3099_v63, %v4007_v40 }
 0x286   :  { %v3107_v11 = vmul.f32 %v3101_v10, %v4007_v40  ;;  %vm3104_vm1 = vcmp.gt.f32.partialorder %v3101_v10, 0.0 }
 0x287   :  { %v3109_v3 = vsel %vm3103_vm15, %v3100_v62, %v3106_v0  ;;  %v4042_v4 = vsel %vm3102_vm0, %v3099_v63, %v3105_v2 }
 0x288   :  { %3137 = vrot.lane.b32.xlu0 %v3109_v3, %s3606_s2  ;;  %3112 = vrot.lane.b32.xlu1 %v4042_v4, %s3594_s18  ;;  %v3110_v12 = vsel %vm3104_vm1, %v3101_v10, %v3107_v11  ;;  %s3612_s18 = smov 98  }
 0x28c   :  { %3115 = vrot.lane.b32.xlu0 %v4042_v4, %s3601_s23  ;;  %3140 = vrot.lane.b32.xlu1 %v3109_v3, %s3595_s19 }
 0x290   :  { %3118 = vrot.lane.b32.xlu0 %v4042_v4, %s3603_s0  ;;  %3143 = vrot.lane.b32.xlu1 %v3109_v3, %s3597_s21 }
 0x294   :  { %3121 = vrot.lane.b32.xlu0 %v4042_v4, %s3605_s26  ;;  %3146 = vrot.lane.b32.xlu1 %v3109_v3, %s3610_s30 }
 0x298   :  { %3152 = vrot.lane.b32.xlu0 %v3109_v3, %s3609_s29  ;;  %3149 = vrot.lane.b32.xlu1 %v3109_v3, %s3608_s28 }
 0x29c   :  { %3158 = vrot.lane.b32.xlu0 %v3110_v12, %s3611_s5  ;;  %3124 = vrot.lane.b32.xlu1 %v4042_v4, %s3602_s24 }
 0x2a0   :  { %3131 = vrot.lane.b32.xlu0 %v4042_v4, %s3604_s25  ;;  %3156 = vrot.lane.b32.xlu1 %v3109_v3, %s3611_s5 }
 0x2a4   :  { %1597 = vrot.lane.b32.xlu0 %v1543_v51, %s3612_s18  ;;  %3127 = vrot.lane.b32.xlu1 %v4042_v4, %s3607_s27 }
 0x2a8   :  { %3133 = vrot.lane.b32.xlu1 %v3109_v3, %s3604_s25 }
 0x2ac   :  { %3162 = vrot.lane.b32.xlu1 %v3110_v12, %s3612_s18 }
 0x2b8   :  { %v1546_v13 = vpop.permute.xlu1 %1545  ;;  %v1549_v14 = vpop.permute.xlu0 %1548 }
 0x2b9   :  { %v1601_v17 = vsel %vm1600_vm2, %v4010_v43, %v1546_v13 }
 0x2ba   :  { %v1602_v20 = vsel %vm1508_vm11, %v1601_v17, %v1549_v14 }
 0x2bc   :  { %v1552_v16 = vpop.permute.xlu1 %1551  ;;  %v1558_v19 = vpop.permute.xlu0 %1557 }
 0x2bd   :  { %v1604_v6 = vsel %vm1603_vm3, %v1602_v20, %v1552_v16 }
 0x2c0   :  { %v1555_v18 = vpop.permute.xlu1 %1554  ;;  %v1565_v21 = vpop.permute.xlu0 %1564 }
 0x2c1   :  { %v1606_v9 = vsel %vm1605_vm4, %v1604_v6, %v1555_v18 }
 0x2c2   :  { %v1608_v7 = vsel %vm1607_vm5, %v1606_v9, %v1558_v19 }
 0x2c4   :  { %v1561_v8 = vpop.permute.xlu1 %1560  ;;  %v1572_v26 = vpop.permute.xlu0 %1571 }
 0x2c5   :  { %v1610_v22 = vsel %vm1609_vm6, %v1608_v7, %v1561_v8 }
 0x2c8   :  { %v1567_v15 = vpop.permute.xlu1 %1566  ;;  %v1578_v23 = vpop.permute.xlu0 %1577 }
 0x2c9   :  { %v1569_v24 = vsel %vm1568_vm7, %v1565_v21, %v1567_v15 }
 0x2ca   :  { %v1612_v25 = vsel %vm1611_vm8, %v1610_v22, %v1569_v24 }
 0x2cb   :  { %1620 = vst [vmem:[%s4119_s4] sm:$0xff] %v1612_v25 }
 0x2cc   :  { %v1584_v27 = vpop.permute.xlu0 %1583  ;;  %v1575_v28 = vpop.permute.xlu1 %1574 }
 0x2cd   :  { %v1613_v43 = vsel %vm1600_vm2, %v1572_v26, %v1575_v28 }
 0x2ce   :  { %v1614_v44 = vsel %vm1508_vm11, %v1613_v43, %v1578_v23 }
 0x2d0   :  { %v1587_v29 = vpop.permute.xlu0 %1586  ;;  %v1581_v31 = vpop.permute.xlu1 %1580 }
 0x2d1   :  { %v1615_v47 = vsel %vm1603_vm3, %v1614_v44, %v1581_v31 }
 0x2d2   :  { %v1616_v48 = vsel %vm1605_vm4, %v1615_v47, %v1584_v27 }
 0x2d3   :  { %v1617_v52 = vsel %vm1607_vm5, %v1616_v48, %v1587_v29 }
 0x2d4   :  { %v1593_v32 = vpop.permute.xlu0 %1592  ;;  %v1591_v30 = vpop.permute.xlu1 %1590 }
 0x2d5   :  { %v1595_v51 = vsel %vm1594_vm9, %v1591_v30, %v1593_v32 }
 0x2d6   :  { %v1618_v55 = vsel %vm1609_vm6, %v1617_v52, %v1595_v51 }
 0x2fa   :  { %v3138_v33 = vpop.permute.xlu0 %3137  ;;  %v3113_v34 = vpop.permute.xlu1 %3112 }
 0x2fb   :  { %v3165_v53 = vsel %vm1600_vm2, %v4042_v4, %v3113_v34 }
 0x2fe   :  { %v3116_v35 = vpop.permute.xlu0 %3115  ;;  %v3141_v36 = vpop.permute.xlu1 %3140 }
 0x2ff   :  { %v3166_v57 = vsel %vm1508_vm11, %v3165_v53, %v3116_v35  ;;  %v3172_v58 = vsel %vm1600_vm2, %v3138_v33, %v3141_v36 }
 0x302   :  { %v3119_v38 = vpop.permute.xlu0 %3118  ;;  %v3144_v37 = vpop.permute.xlu1 %3143 }
 0x303   :  { %v3167_v60 = vsel %vm1603_vm3, %v3166_v57, %v3119_v38  ;;  %v3173_v61 = vsel %vm1508_vm11, %v3172_v58, %v3144_v37 }
 0x306   :  { %v3122_v39 = vpop.permute.xlu0 %3121  ;;  %v3147_v40 = vpop.permute.xlu1 %3146 }
 0x307   :  { %v3168_v1 = vsel %vm1605_vm4, %v3167_v60, %v3122_v39  ;;  %v3174_v62 = vsel %vm1603_vm3, %v3173_v61, %v3147_v40 }
 0x30a   :  { %v3153_v41 = vpop.permute.xlu0 %3152  ;;  %v3150_v42 = vpop.permute.xlu1 %3149 }
 0x30b   :  { %v3175_v63 = vsel %vm1605_vm4, %v3174_v62, %v3150_v42 }
 0x30c   :  { %v3176_v11 = vsel %vm1607_vm5, %v3175_v63, %v3153_v41 }
 0x30e   :  { %v3159_v45 = vpop.permute.xlu0 %3158  ;;  %v3125_v46 = vpop.permute.xlu1 %3124 }
 0x30f   :  { %v3169_v0 = vsel %vm1607_vm5, %v3168_v1, %v3125_v46 }
 0x312   :  { %v3132_v49 = vpop.permute.xlu0 %3131  ;;  %v3157_v50 = vpop.permute.xlu1 %3156 }
 0x313   :  { %v3160_v3 = vsel %vm1594_vm9, %v3157_v50, %v3159_v45 }
 0x314   :  { %v3177_v12 = vsel %vm1609_vm6, %v3176_v11, %v3160_v3 }
 0x316   :  { %v1598_v54 = vpop.permute.xlu0 %1597  ;;  %v3128_v56 = vpop.permute.xlu1 %3127 }
 0x317   :  { %v1619_v59 = vsel %vm1611_vm8, %v1618_v55, %v1598_v54  ;;  %v3170_v4 = vsel %vm1609_vm6, %v3169_v0, %v3128_v56 }
 0x318   :  { %1621 = vst [vmem:[%s4119_s4 + $0x8] sm:$0xff] %v1619_v59 }
 0x31a   :  { %v3134_v2 = vpop.permute.xlu1 %3133 }
 0x31b   :  { %v3135_v5 = vsel %vm1568_vm7, %v3132_v49, %v3134_v2 }
 0x31c   :  { %v3171_v10 = vsel %vm1611_vm8, %v3170_v4, %v3135_v5 }
 0x31d   :  { %3293 = vst [vmem:[%s4119_s4 + $0x10] sm:$0xff] %v3171_v10 }
 0x31e   :  { %v3163_v13 = vpop.permute.xlu1 %3162 }
 0x31f   :  { %v3178_v14 = vsel %vm1611_vm8, %v3177_v12, %v3163_v13 }
 0x320   :  { %3294 = vst [vmem:[%s4119_s4 + $0x18] sm:$0xff] %v3178_v14 }

</bundles_post_ra>
